<compile_context>
chip_gen: v5e
topology: v5e:2x2
jax: 0.10.0
libtpu: 0.0.40
codegen_flags: <defaults>
</compile_context>

<pallas_src>
import functools

import jax
import jax.numpy as jnp
from jax import lax
from jax.experimental import pallas as pl
from jax.experimental.pallas import tpu as pltpu


# Label groups from the PyTorch module are contiguous ranges:
#   support     = {1} U [14, 26]
#   proximity   = [2, 7]
#   comparative = [8, 13]
# so membership is computed with scalar range compares inside the kernel.


def _type_loss_kernel(rel_gt_ref, logits_ref, alpha_ref, out_ref, *,
                      gamma, insnum, n_edges, n_rel):
    E = n_edges

    # ---- fused prepare_typegt: per-edge class bitmask ------------------------
    # Edges live on the sublane axis; one int32 bitmask per edge accumulates
    # the (multi-)hot class set.  Per relation: 1 vector compare + 1 or +
    # 1 select; everything else rides the scalar slots.
    edge_ids = lax.broadcasted_iota(jnp.int32, (E, 1), 0)
    bits = jnp.zeros((E, 1), jnp.int32)

    # n_rel is small and static -> plain Python loop unrolls at trace time.
    for r in range(n_rel):
        ii = rel_gt_ref[3 * r + 0]
        jj = rel_gt_ref[3 * r + 1]
        pred = rel_gt_ref[3 * r + 2]

        is_support = jnp.logical_or(
            pred == 1, jnp.logical_and(pred >= 14, pred <= 26))
        is_prox = jnp.logical_and(pred >= 2, pred <= 7)
        is_comp = jnp.logical_and(pred >= 8, pred <= 13)
        # bit = 1 << type_id, computed directly on the scalar unit.
        bit = jnp.where(is_support, 2,
                        jnp.where(is_prox, 4, jnp.where(is_comp, 8, 1)))

        row = jnp.where(ii < jj,
                        ii * (insnum - 1) + jj - 1,
                        ii * (insnum - 1) + jj)
        # idx_i == idx_j relations are dropped (fold the gate into row = -1).
        row = jnp.where(ii == jj, jnp.int32(-1), row)

        hit = edge_ids == row                       # (E,1) single compare
        bits = jnp.where(hit, bits | bit, bits)     # or + select

    # Edges with no ground-truth relation -> class 0 (bit 0).
    bits = jnp.where(bits == 0, jnp.int32(1), bits)

    class_ids = lax.broadcasted_iota(jnp.int32, (E, 4), 1)
    targets = ((bits >> class_ids) & 1).astype(jnp.float32)      # (E,4) multi-hot

    # ---- focal loss (classes on lanes, 4-wide axis=-1 reduces on XLU) --------
    x = logits_ref[...].astype(jnp.float32)                      # (E, 4)
    m = jnp.max(x, axis=-1, keepdims=True)                       # (E, 1)
    e = jnp.exp(x - m)                                           # (E, 4)
    den = jnp.sum(e, axis=-1, keepdims=True)                     # softmax denom
    num = jnp.sum(e * targets, axis=-1, keepdims=True)           # target prob mass

    # p_t via EUP approximate reciprocal (free slot); clamp so log() is finite.
    p_t = num * pl.reciprocal(den, approx=True)
    p_t = jnp.minimum(jnp.maximum(p_t, jnp.float32(1e-30)), jnp.float32(1.0))
    log_p = jnp.log(p_t)                                         # (E, 1)

    a0 = alpha_ref[0]
    a1 = alpha_ref[1]
    a2 = alpha_ref[2]
    a3 = alpha_ref[3]
    alpha_row = jnp.where(class_ids == 0, a0,
                          jnp.where(class_ids == 1, a1,
                                    jnp.where(class_ids == 2, a2, a3)))
    alpha_t = jnp.sum(targets * alpha_row, axis=-1, keepdims=True)  # (E, 1)

    one_minus = jnp.maximum(1.0 - p_t, 0.0)
    g = float(gamma)
    if g.is_integer() and 0 <= int(g) <= 4:
        gi = int(g)
        if gi == 0:
            loss = -alpha_t * log_p
        else:
            focal_w = one_minus                                  # start at (1-p_t)
            for _ in range(gi - 1):                              # gamma-1 more muls
                focal_w = focal_w * one_minus
            loss = -alpha_t * focal_w * log_p
    else:
        loss = -alpha_t * jnp.power(one_minus, g) * log_p        # 2 EUP ops/elem

    # size_average=True -> mean over edges; scalar goes straight to SMEM.
    out_ref[0, 0] = jnp.sum(loss) * jnp.float32(1.0 / n_edges)


@functools.partial(jax.jit, static_argnames=("gamma", "insnum"))
def type_loss_pallas(type_output, rel_gt, alpha, *, gamma, insnum):
    n_edges = insnum * insnum - insnum
    n_rel = int(rel_gt.shape[0])

    # No layout ops in the wrapper: logits stay (E, 4); rel_gt/alpha flatten to
    # 1-D SMEM arrays (free bitcast reshapes, no extra device launches).
    logits = type_output.astype(jnp.float32)                     # (E, 4)
    rel_gt_flat = rel_gt.astype(jnp.int32).reshape(-1)           # (R*3,)
    alpha_f32 = alpha.astype(jnp.float32).reshape(4)             # (4,)

    kernel = functools.partial(
        _type_loss_kernel,
        gamma=float(gamma),
        insnum=int(insnum),
        n_edges=int(n_edges),
        n_rel=n_rel,
    )

    out = pl.pallas_call(
        kernel,
        out_shape=jax.ShapeDtypeStruct((1, 1), jnp.float32),
        in_specs=[
            pl.BlockSpec(memory_space=pltpu.MemorySpace.SMEM),  # rel_gt (R*3,) i32
            pl.BlockSpec(memory_space=pltpu.MemorySpace.VMEM),  # logits (E,4) f32
            pl.BlockSpec(memory_space=pltpu.MemorySpace.SMEM),  # alpha (4,) f32
        ],
        out_specs=pl.BlockSpec(memory_space=pltpu.MemorySpace.SMEM),
    )(rel_gt_flat, logits, alpha_f32)
    return out[0, 0]


class TypeLossPallas:
    """JAX/Pallas equivalent of the PyTorch TypeLoss module (forward pass)."""

    def __init__(self, gamma, pred_w):
        self.a = 0.5
        self.b = 0.5
        self.gamma = float(gamma)
        # per-class alpha of the focal loss, class_num = 4
        self.alpha = jnp.asarray(pred_w, dtype=jnp.float32).reshape(4)

    def __call__(self, type_output, obj_gt, rel_gt):
        insnum = int(obj_gt.shape[0])
        type_loss = type_loss_pallas(
            type_output, rel_gt, self.alpha, gamma=self.gamma, insnum=insnum)
        edge_loss = type_loss
        return edge_loss


if __name__ == "__main__":
    key = jax.random.PRNGKey(0)
    k_obj, k_idx, k_pred, k_logits = jax.random.split(key, 4)

    insnum = 9                            # number of object instances
    n_edges = insnum * insnum - insnum    # 72 directed edges
    n_rel = 10                            # number of ground-truth relations

    # deterministic synthetic inputs
    obj_gt = jax.random.randint(k_obj, (insnum,), 0, 27, dtype=jnp.int32)
    rel_idx = jax.random.randint(k_idx, (n_rel, 2), 0, insnum, dtype=jnp.int32)
    rel_pred = jax.random.randint(k_pred, (n_rel, 1), 0, 27, dtype=jnp.int32)
    rel_gt = jnp.concatenate([rel_idx, rel_pred], axis=1)          # (R, 3)
    type_output = jax.random.normal(k_logits, (n_edges, 4), jnp.float32)

    pred_w = jnp.array([0.25, 0.5, 1.0, 1.0], dtype=jnp.float32)   # per-class alpha
    loss_mod = TypeLossPallas(gamma=2.0, pred_w=pred_w)

    loss = loss_mod(type_output, obj_gt, rel_gt)
    jax.block_until_ready(loss)
    assert loss.shape == () and jnp.isfinite(loss)
    print("KERNEL_OK")
</pallas_src>

<mosaic_0001>
module attributes {stable_mosaic.version = 11 : i64} {
  func.func @_type_loss_kernel(%arg0: memref<30xi32, #tpu.memory_space<smem>>, %arg1: memref<72x4xf32, #tpu.memory_space<vmem>>, %arg2: memref<4xf32, #tpu.memory_space<smem>>, %arg3: memref<1x1xf32, #tpu.memory_space<smem>>) attributes {dimension_semantics = [], scalar_prefetch = 0 : i64, scratch_operands = 0 : i64, tpu.core_type = #tpu.core_type<tc>} {
    %0 = tpu.iota {dimensions = array<i32: 0>} : vector<72x1xi32>
    %c0_i32 = arith.constant 0 : i32
    %1 = vector.broadcast %c0_i32 : i32 to vector<72x1xi32>
    %c0 = arith.constant 0 : index
    %2 = memref.load %arg0[%c0] : memref<30xi32, #tpu.memory_space<smem>>
    %c1 = arith.constant 1 : index
    %3 = memref.load %arg0[%c1] : memref<30xi32, #tpu.memory_space<smem>>
    %c2 = arith.constant 2 : index
    %4 = memref.load %arg0[%c2] : memref<30xi32, #tpu.memory_space<smem>>
    %c1_i32 = arith.constant 1 : i32
    %5 = arith.cmpi eq, %4, %c1_i32 : i32
    %c14_i32 = arith.constant 14 : i32
    %6 = arith.cmpi sge, %4, %c14_i32 : i32
    %c26_i32 = arith.constant 26 : i32
    %7 = arith.cmpi sle, %4, %c26_i32 : i32
    %8 = arith.andi %6, %7 : i1
    %9 = arith.ori %5, %8 : i1
    %c2_i32 = arith.constant 2 : i32
    %10 = arith.cmpi sge, %4, %c2_i32 : i32
    %c7_i32 = arith.constant 7 : i32
    %11 = arith.cmpi sle, %4, %c7_i32 : i32
    %12 = arith.andi %10, %11 : i1
    %c8_i32 = arith.constant 8 : i32
    %13 = arith.cmpi sge, %4, %c8_i32 : i32
    %c13_i32 = arith.constant 13 : i32
    %14 = arith.cmpi sle, %4, %c13_i32 : i32
    %15 = arith.andi %13, %14 : i1
    %c8_i32_0 = arith.constant 8 : i32
    %c1_i32_1 = arith.constant 1 : i32
    %16 = arith.select %15, %c8_i32_0, %c1_i32_1 : i32
    %c4_i32 = arith.constant 4 : i32
    %17 = arith.select %12, %c4_i32, %16 : i32
    %c2_i32_2 = arith.constant 2 : i32
    %18 = arith.select %9, %c2_i32_2, %17 : i32
    %19 = arith.cmpi slt, %2, %3 : i32
    %c8_i32_3 = arith.constant 8 : i32
    %20 = arith.muli %2, %c8_i32_3 : i32
    %21 = arith.addi %20, %3 : i32
    %c1_i32_4 = arith.constant 1 : i32
    %22 = arith.subi %21, %c1_i32_4 : i32
    %c8_i32_5 = arith.constant 8 : i32
    %23 = arith.muli %2, %c8_i32_5 : i32
    %24 = arith.addi %23, %3 : i32
    %25 = arith.select %19, %22, %24 : i32
    %26 = arith.cmpi eq, %2, %3 : i32
    %c-1_i32 = arith.constant -1 : i32
    %27 = arith.select %26, %c-1_i32, %25 : i32
    %28 = vector.broadcast %27 : i32 to vector<72x1xi32>
    %29 = arith.cmpi eq, %0, %28 : vector<72x1xi32>
    %30 = vector.broadcast %18 : i32 to vector<72x1xi32>
    %31 = arith.ori %1, %30 : vector<72x1xi32>
    %32 = arith.select %29, %31, %1 : vector<72x1xi1>, vector<72x1xi32>
    %c3 = arith.constant 3 : index
    %33 = memref.load %arg0[%c3] : memref<30xi32, #tpu.memory_space<smem>>
    %c4 = arith.constant 4 : index
    %34 = memref.load %arg0[%c4] : memref<30xi32, #tpu.memory_space<smem>>
    %c5 = arith.constant 5 : index
    %35 = memref.load %arg0[%c5] : memref<30xi32, #tpu.memory_space<smem>>
    %c1_i32_6 = arith.constant 1 : i32
    %36 = arith.cmpi eq, %35, %c1_i32_6 : i32
    %c14_i32_7 = arith.constant 14 : i32
    %37 = arith.cmpi sge, %35, %c14_i32_7 : i32
    %c26_i32_8 = arith.constant 26 : i32
    %38 = arith.cmpi sle, %35, %c26_i32_8 : i32
    %39 = arith.andi %37, %38 : i1
    %40 = arith.ori %36, %39 : i1
    %c2_i32_9 = arith.constant 2 : i32
    %41 = arith.cmpi sge, %35, %c2_i32_9 : i32
    %c7_i32_10 = arith.constant 7 : i32
    %42 = arith.cmpi sle, %35, %c7_i32_10 : i32
    %43 = arith.andi %41, %42 : i1
    %c8_i32_11 = arith.constant 8 : i32
    %44 = arith.cmpi sge, %35, %c8_i32_11 : i32
    %c13_i32_12 = arith.constant 13 : i32
    %45 = arith.cmpi sle, %35, %c13_i32_12 : i32
    %46 = arith.andi %44, %45 : i1
    %c8_i32_13 = arith.constant 8 : i32
    %c1_i32_14 = arith.constant 1 : i32
    %47 = arith.select %46, %c8_i32_13, %c1_i32_14 : i32
    %c4_i32_15 = arith.constant 4 : i32
    %48 = arith.select %43, %c4_i32_15, %47 : i32
    %c2_i32_16 = arith.constant 2 : i32
    %49 = arith.select %40, %c2_i32_16, %48 : i32
    %50 = arith.cmpi slt, %33, %34 : i32
    %c8_i32_17 = arith.constant 8 : i32
    %51 = arith.muli %33, %c8_i32_17 : i32
    %52 = arith.addi %51, %34 : i32
    %c1_i32_18 = arith.constant 1 : i32
    %53 = arith.subi %52, %c1_i32_18 : i32
    %c8_i32_19 = arith.constant 8 : i32
    %54 = arith.muli %33, %c8_i32_19 : i32
    %55 = arith.addi %54, %34 : i32
    %56 = arith.select %50, %53, %55 : i32
    %57 = arith.cmpi eq, %33, %34 : i32
    %c-1_i32_20 = arith.constant -1 : i32
    %58 = arith.select %57, %c-1_i32_20, %56 : i32
    %59 = vector.broadcast %58 : i32 to vector<72x1xi32>
    %60 = arith.cmpi eq, %0, %59 : vector<72x1xi32>
    %61 = vector.broadcast %49 : i32 to vector<72x1xi32>
    %62 = arith.ori %32, %61 : vector<72x1xi32>
    %63 = arith.select %60, %62, %32 : vector<72x1xi1>, vector<72x1xi32>
    %c6 = arith.constant 6 : index
    %64 = memref.load %arg0[%c6] : memref<30xi32, #tpu.memory_space<smem>>
    %c7 = arith.constant 7 : index
    %65 = memref.load %arg0[%c7] : memref<30xi32, #tpu.memory_space<smem>>
    %c8 = arith.constant 8 : index
    %66 = memref.load %arg0[%c8] : memref<30xi32, #tpu.memory_space<smem>>
    %c1_i32_21 = arith.constant 1 : i32
    %67 = arith.cmpi eq, %66, %c1_i32_21 : i32
    %c14_i32_22 = arith.constant 14 : i32
    %68 = arith.cmpi sge, %66, %c14_i32_22 : i32
    %c26_i32_23 = arith.constant 26 : i32
    %69 = arith.cmpi sle, %66, %c26_i32_23 : i32
    %70 = arith.andi %68, %69 : i1
    %71 = arith.ori %67, %70 : i1
    %c2_i32_24 = arith.constant 2 : i32
    %72 = arith.cmpi sge, %66, %c2_i32_24 : i32
    %c7_i32_25 = arith.constant 7 : i32
    %73 = arith.cmpi sle, %66, %c7_i32_25 : i32
    %74 = arith.andi %72, %73 : i1
    %c8_i32_26 = arith.constant 8 : i32
    %75 = arith.cmpi sge, %66, %c8_i32_26 : i32
    %c13_i32_27 = arith.constant 13 : i32
    %76 = arith.cmpi sle, %66, %c13_i32_27 : i32
    %77 = arith.andi %75, %76 : i1
    %c8_i32_28 = arith.constant 8 : i32
    %c1_i32_29 = arith.constant 1 : i32
    %78 = arith.select %77, %c8_i32_28, %c1_i32_29 : i32
    %c4_i32_30 = arith.constant 4 : i32
    %79 = arith.select %74, %c4_i32_30, %78 : i32
    %c2_i32_31 = arith.constant 2 : i32
    %80 = arith.select %71, %c2_i32_31, %79 : i32
    %81 = arith.cmpi slt, %64, %65 : i32
    %c8_i32_32 = arith.constant 8 : i32
    %82 = arith.muli %64, %c8_i32_32 : i32
    %83 = arith.addi %82, %65 : i32
    %c1_i32_33 = arith.constant 1 : i32
    %84 = arith.subi %83, %c1_i32_33 : i32
    %c8_i32_34 = arith.constant 8 : i32
    %85 = arith.muli %64, %c8_i32_34 : i32
    %86 = arith.addi %85, %65 : i32
    %87 = arith.select %81, %84, %86 : i32
    %88 = arith.cmpi eq, %64, %65 : i32
    %c-1_i32_35 = arith.constant -1 : i32
    %89 = arith.select %88, %c-1_i32_35, %87 : i32
    %90 = vector.broadcast %89 : i32 to vector<72x1xi32>
    %91 = arith.cmpi eq, %0, %90 : vector<72x1xi32>
    %92 = vector.broadcast %80 : i32 to vector<72x1xi32>
    %93 = arith.ori %63, %92 : vector<72x1xi32>
    %94 = arith.select %91, %93, %63 : vector<72x1xi1>, vector<72x1xi32>
    %c9 = arith.constant 9 : index
    %95 = memref.load %arg0[%c9] : memref<30xi32, #tpu.memory_space<smem>>
    %c10 = arith.constant 10 : index
    %96 = memref.load %arg0[%c10] : memref<30xi32, #tpu.memory_space<smem>>
    %c11 = arith.constant 11 : index
    %97 = memref.load %arg0[%c11] : memref<30xi32, #tpu.memory_space<smem>>
    %c1_i32_36 = arith.constant 1 : i32
    %98 = arith.cmpi eq, %97, %c1_i32_36 : i32
    %c14_i32_37 = arith.constant 14 : i32
    %99 = arith.cmpi sge, %97, %c14_i32_37 : i32
    %c26_i32_38 = arith.constant 26 : i32
    %100 = arith.cmpi sle, %97, %c26_i32_38 : i32
    %101 = arith.andi %99, %100 : i1
    %102 = arith.ori %98, %101 : i1
    %c2_i32_39 = arith.constant 2 : i32
    %103 = arith.cmpi sge, %97, %c2_i32_39 : i32
    %c7_i32_40 = arith.constant 7 : i32
    %104 = arith.cmpi sle, %97, %c7_i32_40 : i32
    %105 = arith.andi %103, %104 : i1
    %c8_i32_41 = arith.constant 8 : i32
    %106 = arith.cmpi sge, %97, %c8_i32_41 : i32
    %c13_i32_42 = arith.constant 13 : i32
    %107 = arith.cmpi sle, %97, %c13_i32_42 : i32
    %108 = arith.andi %106, %107 : i1
    %c8_i32_43 = arith.constant 8 : i32
    %c1_i32_44 = arith.constant 1 : i32
    %109 = arith.select %108, %c8_i32_43, %c1_i32_44 : i32
    %c4_i32_45 = arith.constant 4 : i32
    %110 = arith.select %105, %c4_i32_45, %109 : i32
    %c2_i32_46 = arith.constant 2 : i32
    %111 = arith.select %102, %c2_i32_46, %110 : i32
    %112 = arith.cmpi slt, %95, %96 : i32
    %c8_i32_47 = arith.constant 8 : i32
    %113 = arith.muli %95, %c8_i32_47 : i32
    %114 = arith.addi %113, %96 : i32
    %c1_i32_48 = arith.constant 1 : i32
    %115 = arith.subi %114, %c1_i32_48 : i32
    %c8_i32_49 = arith.constant 8 : i32
    %116 = arith.muli %95, %c8_i32_49 : i32
    %117 = arith.addi %116, %96 : i32
    %118 = arith.select %112, %115, %117 : i32
    %119 = arith.cmpi eq, %95, %96 : i32
    %c-1_i32_50 = arith.constant -1 : i32
    %120 = arith.select %119, %c-1_i32_50, %118 : i32
    %121 = vector.broadcast %120 : i32 to vector<72x1xi32>
    %122 = arith.cmpi eq, %0, %121 : vector<72x1xi32>
    %123 = vector.broadcast %111 : i32 to vector<72x1xi32>
    %124 = arith.ori %94, %123 : vector<72x1xi32>
    %125 = arith.select %122, %124, %94 : vector<72x1xi1>, vector<72x1xi32>
    %c12 = arith.constant 12 : index
    %126 = memref.load %arg0[%c12] : memref<30xi32, #tpu.memory_space<smem>>
    %c13 = arith.constant 13 : index
    %127 = memref.load %arg0[%c13] : memref<30xi32, #tpu.memory_space<smem>>
    %c14 = arith.constant 14 : index
    %128 = memref.load %arg0[%c14] : memref<30xi32, #tpu.memory_space<smem>>
    %c1_i32_51 = arith.constant 1 : i32
    %129 = arith.cmpi eq, %128, %c1_i32_51 : i32
    %c14_i32_52 = arith.constant 14 : i32
    %130 = arith.cmpi sge, %128, %c14_i32_52 : i32
    %c26_i32_53 = arith.constant 26 : i32
    %131 = arith.cmpi sle, %128, %c26_i32_53 : i32
    %132 = arith.andi %130, %131 : i1
    %133 = arith.ori %129, %132 : i1
    %c2_i32_54 = arith.constant 2 : i32
    %134 = arith.cmpi sge, %128, %c2_i32_54 : i32
    %c7_i32_55 = arith.constant 7 : i32
    %135 = arith.cmpi sle, %128, %c7_i32_55 : i32
    %136 = arith.andi %134, %135 : i1
    %c8_i32_56 = arith.constant 8 : i32
    %137 = arith.cmpi sge, %128, %c8_i32_56 : i32
    %c13_i32_57 = arith.constant 13 : i32
    %138 = arith.cmpi sle, %128, %c13_i32_57 : i32
    %139 = arith.andi %137, %138 : i1
    %c8_i32_58 = arith.constant 8 : i32
    %c1_i32_59 = arith.constant 1 : i32
    %140 = arith.select %139, %c8_i32_58, %c1_i32_59 : i32
    %c4_i32_60 = arith.constant 4 : i32
    %141 = arith.select %136, %c4_i32_60, %140 : i32
    %c2_i32_61 = arith.constant 2 : i32
    %142 = arith.select %133, %c2_i32_61, %141 : i32
    %143 = arith.cmpi slt, %126, %127 : i32
    %c8_i32_62 = arith.constant 8 : i32
    %144 = arith.muli %126, %c8_i32_62 : i32
    %145 = arith.addi %144, %127 : i32
    %c1_i32_63 = arith.constant 1 : i32
    %146 = arith.subi %145, %c1_i32_63 : i32
    %c8_i32_64 = arith.constant 8 : i32
    %147 = arith.muli %126, %c8_i32_64 : i32
    %148 = arith.addi %147, %127 : i32
    %149 = arith.select %143, %146, %148 : i32
    %150 = arith.cmpi eq, %126, %127 : i32
    %c-1_i32_65 = arith.constant -1 : i32
    %151 = arith.select %150, %c-1_i32_65, %149 : i32
    %152 = vector.broadcast %151 : i32 to vector<72x1xi32>
    %153 = arith.cmpi eq, %0, %152 : vector<72x1xi32>
    %154 = vector.broadcast %142 : i32 to vector<72x1xi32>
    %155 = arith.ori %125, %154 : vector<72x1xi32>
    %156 = arith.select %153, %155, %125 : vector<72x1xi1>, vector<72x1xi32>
    %c15 = arith.constant 15 : index
    %157 = memref.load %arg0[%c15] : memref<30xi32, #tpu.memory_space<smem>>
    %c16 = arith.constant 16 : index
    %158 = memref.load %arg0[%c16] : memref<30xi32, #tpu.memory_space<smem>>
    %c17 = arith.constant 17 : index
    %159 = memref.load %arg0[%c17] : memref<30xi32, #tpu.memory_space<smem>>
    %c1_i32_66 = arith.constant 1 : i32
    %160 = arith.cmpi eq, %159, %c1_i32_66 : i32
    %c14_i32_67 = arith.constant 14 : i32
    %161 = arith.cmpi sge, %159, %c14_i32_67 : i32
    %c26_i32_68 = arith.constant 26 : i32
    %162 = arith.cmpi sle, %159, %c26_i32_68 : i32
    %163 = arith.andi %161, %162 : i1
    %164 = arith.ori %160, %163 : i1
    %c2_i32_69 = arith.constant 2 : i32
    %165 = arith.cmpi sge, %159, %c2_i32_69 : i32
    %c7_i32_70 = arith.constant 7 : i32
    %166 = arith.cmpi sle, %159, %c7_i32_70 : i32
    %167 = arith.andi %165, %166 : i1
    %c8_i32_71 = arith.constant 8 : i32
    %168 = arith.cmpi sge, %159, %c8_i32_71 : i32
    %c13_i32_72 = arith.constant 13 : i32
    %169 = arith.cmpi sle, %159, %c13_i32_72 : i32
    %170 = arith.andi %168, %169 : i1
    %c8_i32_73 = arith.constant 8 : i32
    %c1_i32_74 = arith.constant 1 : i32
    %171 = arith.select %170, %c8_i32_73, %c1_i32_74 : i32
    %c4_i32_75 = arith.constant 4 : i32
    %172 = arith.select %167, %c4_i32_75, %171 : i32
    %c2_i32_76 = arith.constant 2 : i32
    %173 = arith.select %164, %c2_i32_76, %172 : i32
    %174 = arith.cmpi slt, %157, %158 : i32
    %c8_i32_77 = arith.constant 8 : i32
    %175 = arith.muli %157, %c8_i32_77 : i32
    %176 = arith.addi %175, %158 : i32
    %c1_i32_78 = arith.constant 1 : i32
    %177 = arith.subi %176, %c1_i32_78 : i32
    %c8_i32_79 = arith.constant 8 : i32
    %178 = arith.muli %157, %c8_i32_79 : i32
    %179 = arith.addi %178, %158 : i32
    %180 = arith.select %174, %177, %179 : i32
    %181 = arith.cmpi eq, %157, %158 : i32
    %c-1_i32_80 = arith.constant -1 : i32
    %182 = arith.select %181, %c-1_i32_80, %180 : i32
    %183 = vector.broadcast %182 : i32 to vector<72x1xi32>
    %184 = arith.cmpi eq, %0, %183 : vector<72x1xi32>
    %185 = vector.broadcast %173 : i32 to vector<72x1xi32>
    %186 = arith.ori %156, %185 : vector<72x1xi32>
    %187 = arith.select %184, %186, %156 : vector<72x1xi1>, vector<72x1xi32>
    %c18 = arith.constant 18 : index
    %188 = memref.load %arg0[%c18] : memref<30xi32, #tpu.memory_space<smem>>
    %c19 = arith.constant 19 : index
    %189 = memref.load %arg0[%c19] : memref<30xi32, #tpu.memory_space<smem>>
    %c20 = arith.constant 20 : index
    %190 = memref.load %arg0[%c20] : memref<30xi32, #tpu.memory_space<smem>>
    %c1_i32_81 = arith.constant 1 : i32
    %191 = arith.cmpi eq, %190, %c1_i32_81 : i32
    %c14_i32_82 = arith.constant 14 : i32
    %192 = arith.cmpi sge, %190, %c14_i32_82 : i32
    %c26_i32_83 = arith.constant 26 : i32
    %193 = arith.cmpi sle, %190, %c26_i32_83 : i32
    %194 = arith.andi %192, %193 : i1
    %195 = arith.ori %191, %194 : i1
    %c2_i32_84 = arith.constant 2 : i32
    %196 = arith.cmpi sge, %190, %c2_i32_84 : i32
    %c7_i32_85 = arith.constant 7 : i32
    %197 = arith.cmpi sle, %190, %c7_i32_85 : i32
    %198 = arith.andi %196, %197 : i1
    %c8_i32_86 = arith.constant 8 : i32
    %199 = arith.cmpi sge, %190, %c8_i32_86 : i32
    %c13_i32_87 = arith.constant 13 : i32
    %200 = arith.cmpi sle, %190, %c13_i32_87 : i32
    %201 = arith.andi %199, %200 : i1
    %c8_i32_88 = arith.constant 8 : i32
    %c1_i32_89 = arith.constant 1 : i32
    %202 = arith.select %201, %c8_i32_88, %c1_i32_89 : i32
    %c4_i32_90 = arith.constant 4 : i32
    %203 = arith.select %198, %c4_i32_90, %202 : i32
    %c2_i32_91 = arith.constant 2 : i32
    %204 = arith.select %195, %c2_i32_91, %203 : i32
    %205 = arith.cmpi slt, %188, %189 : i32
    %c8_i32_92 = arith.constant 8 : i32
    %206 = arith.muli %188, %c8_i32_92 : i32
    %207 = arith.addi %206, %189 : i32
    %c1_i32_93 = arith.constant 1 : i32
    %208 = arith.subi %207, %c1_i32_93 : i32
    %c8_i32_94 = arith.constant 8 : i32
    %209 = arith.muli %188, %c8_i32_94 : i32
    %210 = arith.addi %209, %189 : i32
    %211 = arith.select %205, %208, %210 : i32
    %212 = arith.cmpi eq, %188, %189 : i32
    %c-1_i32_95 = arith.constant -1 : i32
    %213 = arith.select %212, %c-1_i32_95, %211 : i32
    %214 = vector.broadcast %213 : i32 to vector<72x1xi32>
    %215 = arith.cmpi eq, %0, %214 : vector<72x1xi32>
    %216 = vector.broadcast %204 : i32 to vector<72x1xi32>
    %217 = arith.ori %187, %216 : vector<72x1xi32>
    %218 = arith.select %215, %217, %187 : vector<72x1xi1>, vector<72x1xi32>
    %c21 = arith.constant 21 : index
    %219 = memref.load %arg0[%c21] : memref<30xi32, #tpu.memory_space<smem>>
    %c22 = arith.constant 22 : index
    %220 = memref.load %arg0[%c22] : memref<30xi32, #tpu.memory_space<smem>>
    %c23 = arith.constant 23 : index
    %221 = memref.load %arg0[%c23] : memref<30xi32, #tpu.memory_space<smem>>
    %c1_i32_96 = arith.constant 1 : i32
    %222 = arith.cmpi eq, %221, %c1_i32_96 : i32
    %c14_i32_97 = arith.constant 14 : i32
    %223 = arith.cmpi sge, %221, %c14_i32_97 : i32
    %c26_i32_98 = arith.constant 26 : i32
    %224 = arith.cmpi sle, %221, %c26_i32_98 : i32
    %225 = arith.andi %223, %224 : i1
    %226 = arith.ori %222, %225 : i1
    %c2_i32_99 = arith.constant 2 : i32
    %227 = arith.cmpi sge, %221, %c2_i32_99 : i32
    %c7_i32_100 = arith.constant 7 : i32
    %228 = arith.cmpi sle, %221, %c7_i32_100 : i32
    %229 = arith.andi %227, %228 : i1
    %c8_i32_101 = arith.constant 8 : i32
    %230 = arith.cmpi sge, %221, %c8_i32_101 : i32
    %c13_i32_102 = arith.constant 13 : i32
    %231 = arith.cmpi sle, %221, %c13_i32_102 : i32
    %232 = arith.andi %230, %231 : i1
    %c8_i32_103 = arith.constant 8 : i32
    %c1_i32_104 = arith.constant 1 : i32
    %233 = arith.select %232, %c8_i32_103, %c1_i32_104 : i32
    %c4_i32_105 = arith.constant 4 : i32
    %234 = arith.select %229, %c4_i32_105, %233 : i32
    %c2_i32_106 = arith.constant 2 : i32
    %235 = arith.select %226, %c2_i32_106, %234 : i32
    %236 = arith.cmpi slt, %219, %220 : i32
    %c8_i32_107 = arith.constant 8 : i32
    %237 = arith.muli %219, %c8_i32_107 : i32
    %238 = arith.addi %237, %220 : i32
    %c1_i32_108 = arith.constant 1 : i32
    %239 = arith.subi %238, %c1_i32_108 : i32
    %c8_i32_109 = arith.constant 8 : i32
    %240 = arith.muli %219, %c8_i32_109 : i32
    %241 = arith.addi %240, %220 : i32
    %242 = arith.select %236, %239, %241 : i32
    %243 = arith.cmpi eq, %219, %220 : i32
    %c-1_i32_110 = arith.constant -1 : i32
    %244 = arith.select %243, %c-1_i32_110, %242 : i32
    %245 = vector.broadcast %244 : i32 to vector<72x1xi32>
    %246 = arith.cmpi eq, %0, %245 : vector<72x1xi32>
    %247 = vector.broadcast %235 : i32 to vector<72x1xi32>
    %248 = arith.ori %218, %247 : vector<72x1xi32>
    %249 = arith.select %246, %248, %218 : vector<72x1xi1>, vector<72x1xi32>
    %c24 = arith.constant 24 : index
    %250 = memref.load %arg0[%c24] : memref<30xi32, #tpu.memory_space<smem>>
    %c25 = arith.constant 25 : index
    %251 = memref.load %arg0[%c25] : memref<30xi32, #tpu.memory_space<smem>>
    %c26 = arith.constant 26 : index
    %252 = memref.load %arg0[%c26] : memref<30xi32, #tpu.memory_space<smem>>
    %c1_i32_111 = arith.constant 1 : i32
    %253 = arith.cmpi eq, %252, %c1_i32_111 : i32
    %c14_i32_112 = arith.constant 14 : i32
    %254 = arith.cmpi sge, %252, %c14_i32_112 : i32
    %c26_i32_113 = arith.constant 26 : i32
    %255 = arith.cmpi sle, %252, %c26_i32_113 : i32
    %256 = arith.andi %254, %255 : i1
    %257 = arith.ori %253, %256 : i1
    %c2_i32_114 = arith.constant 2 : i32
    %258 = arith.cmpi sge, %252, %c2_i32_114 : i32
    %c7_i32_115 = arith.constant 7 : i32
    %259 = arith.cmpi sle, %252, %c7_i32_115 : i32
    %260 = arith.andi %258, %259 : i1
    %c8_i32_116 = arith.constant 8 : i32
    %261 = arith.cmpi sge, %252, %c8_i32_116 : i32
    %c13_i32_117 = arith.constant 13 : i32
    %262 = arith.cmpi sle, %252, %c13_i32_117 : i32
    %263 = arith.andi %261, %262 : i1
    %c8_i32_118 = arith.constant 8 : i32
    %c1_i32_119 = arith.constant 1 : i32
    %264 = arith.select %263, %c8_i32_118, %c1_i32_119 : i32
    %c4_i32_120 = arith.constant 4 : i32
    %265 = arith.select %260, %c4_i32_120, %264 : i32
    %c2_i32_121 = arith.constant 2 : i32
    %266 = arith.select %257, %c2_i32_121, %265 : i32
    %267 = arith.cmpi slt, %250, %251 : i32
    %c8_i32_122 = arith.constant 8 : i32
    %268 = arith.muli %250, %c8_i32_122 : i32
    %269 = arith.addi %268, %251 : i32
    %c1_i32_123 = arith.constant 1 : i32
    %270 = arith.subi %269, %c1_i32_123 : i32
    %c8_i32_124 = arith.constant 8 : i32
    %271 = arith.muli %250, %c8_i32_124 : i32
    %272 = arith.addi %271, %251 : i32
    %273 = arith.select %267, %270, %272 : i32
    %274 = arith.cmpi eq, %250, %251 : i32
    %c-1_i32_125 = arith.constant -1 : i32
    %275 = arith.select %274, %c-1_i32_125, %273 : i32
    %276 = vector.broadcast %275 : i32 to vector<72x1xi32>
    %277 = arith.cmpi eq, %0, %276 : vector<72x1xi32>
    %278 = vector.broadcast %266 : i32 to vector<72x1xi32>
    %279 = arith.ori %249, %278 : vector<72x1xi32>
    %280 = arith.select %277, %279, %249 : vector<72x1xi1>, vector<72x1xi32>
    %c27 = arith.constant 27 : index
    %281 = memref.load %arg0[%c27] : memref<30xi32, #tpu.memory_space<smem>>
    %c28 = arith.constant 28 : index
    %282 = memref.load %arg0[%c28] : memref<30xi32, #tpu.memory_space<smem>>
    %c29 = arith.constant 29 : index
    %283 = memref.load %arg0[%c29] : memref<30xi32, #tpu.memory_space<smem>>
    %c1_i32_126 = arith.constant 1 : i32
    %284 = arith.cmpi eq, %283, %c1_i32_126 : i32
    %c14_i32_127 = arith.constant 14 : i32
    %285 = arith.cmpi sge, %283, %c14_i32_127 : i32
    %c26_i32_128 = arith.constant 26 : i32
    %286 = arith.cmpi sle, %283, %c26_i32_128 : i32
    %287 = arith.andi %285, %286 : i1
    %288 = arith.ori %284, %287 : i1
    %c2_i32_129 = arith.constant 2 : i32
    %289 = arith.cmpi sge, %283, %c2_i32_129 : i32
    %c7_i32_130 = arith.constant 7 : i32
    %290 = arith.cmpi sle, %283, %c7_i32_130 : i32
    %291 = arith.andi %289, %290 : i1
    %c8_i32_131 = arith.constant 8 : i32
    %292 = arith.cmpi sge, %283, %c8_i32_131 : i32
    %c13_i32_132 = arith.constant 13 : i32
    %293 = arith.cmpi sle, %283, %c13_i32_132 : i32
    %294 = arith.andi %292, %293 : i1
    %c8_i32_133 = arith.constant 8 : i32
    %c1_i32_134 = arith.constant 1 : i32
    %295 = arith.select %294, %c8_i32_133, %c1_i32_134 : i32
    %c4_i32_135 = arith.constant 4 : i32
    %296 = arith.select %291, %c4_i32_135, %295 : i32
    %c2_i32_136 = arith.constant 2 : i32
    %297 = arith.select %288, %c2_i32_136, %296 : i32
    %298 = arith.cmpi slt, %281, %282 : i32
    %c8_i32_137 = arith.constant 8 : i32
    %299 = arith.muli %281, %c8_i32_137 : i32
    %300 = arith.addi %299, %282 : i32
    %c1_i32_138 = arith.constant 1 : i32
    %301 = arith.subi %300, %c1_i32_138 : i32
    %c8_i32_139 = arith.constant 8 : i32
    %302 = arith.muli %281, %c8_i32_139 : i32
    %303 = arith.addi %302, %282 : i32
    %304 = arith.select %298, %301, %303 : i32
    %305 = arith.cmpi eq, %281, %282 : i32
    %c-1_i32_140 = arith.constant -1 : i32
    %306 = arith.select %305, %c-1_i32_140, %304 : i32
    %307 = vector.broadcast %306 : i32 to vector<72x1xi32>
    %308 = arith.cmpi eq, %0, %307 : vector<72x1xi32>
    %309 = vector.broadcast %297 : i32 to vector<72x1xi32>
    %310 = arith.ori %280, %309 : vector<72x1xi32>
    %311 = arith.select %308, %310, %280 : vector<72x1xi1>, vector<72x1xi32>
    %c0_i32_141 = arith.constant 0 : i32
    %312 = vector.broadcast %c0_i32_141 : i32 to vector<72x1xi32>
    %313 = arith.cmpi eq, %311, %312 : vector<72x1xi32>
    %c1_i32_142 = arith.constant 1 : i32
    %314 = vector.broadcast %c1_i32_142 : i32 to vector<72x1xi32>
    %315 = arith.select %313, %314, %311 : vector<72x1xi1>, vector<72x1xi32>
    %316 = tpu.iota {dimensions = array<i32: 1>} : vector<72x4xi32>
    %317 = vector.broadcast %315 : vector<72x1xi32> to vector<72x4xi32>
    %318 = arith.shrsi %317, %316 : vector<72x4xi32>
    %c1_i32_143 = arith.constant 1 : i32
    %319 = vector.broadcast %c1_i32_143 : i32 to vector<72x4xi32>
    %320 = arith.andi %318, %319 : vector<72x4xi32>
    %321 = arith.sitofp %320 : vector<72x4xi32> to vector<72x4xf32>
    %c0_144 = arith.constant 0 : index
    %c0_145 = arith.constant 0 : index
    %322 = vector.load %arg1[%c0_144, %c0_145] : memref<72x4xf32, #tpu.memory_space<vmem>>, vector<72x4xf32>
    %cst = arith.constant dense<0xFF800000> : vector<72xf32>
    %323 = vector.multi_reduction <maximumf>, %322, %cst [1] : vector<72x4xf32> to vector<72xf32>
    %324 = vector.shape_cast %323 : vector<72xf32> to vector<72x1xf32>
    %325 = vector.broadcast %324 : vector<72x1xf32> to vector<72x4xf32>
    %326 = arith.subf %322, %325 : vector<72x4xf32>
    %327 = math.exp %326 : vector<72x4xf32>
    %cst_146 = arith.constant dense<0.000000e+00> : vector<72xf32>
    %328 = vector.multi_reduction <add>, %327, %cst_146 [1] : vector<72x4xf32> to vector<72xf32>
    %329 = vector.shape_cast %328 : vector<72xf32> to vector<72x1xf32>
    %330 = arith.mulf %327, %321 : vector<72x4xf32>
    %cst_147 = arith.constant dense<0.000000e+00> : vector<72xf32>
    %331 = vector.multi_reduction <add>, %330, %cst_147 [1] : vector<72x4xf32> to vector<72xf32>
    %332 = vector.shape_cast %331 : vector<72xf32> to vector<72x1xf32>
    %333 = tpu.reciprocal %329 {approx = true} : vector<72x1xf32> -> vector<72x1xf32>
    %334 = arith.mulf %332, %333 : vector<72x1xf32>
    %cst_148 = arith.constant 1.000000e-30 : f32
    %335 = vector.broadcast %cst_148 : f32 to vector<72x1xf32>
    %336 = arith.maximumf %334, %335 : vector<72x1xf32>
    %cst_149 = arith.constant 1.000000e+00 : f32
    %337 = vector.broadcast %cst_149 : f32 to vector<72x1xf32>
    %338 = arith.minimumf %336, %337 : vector<72x1xf32>
    %339 = math.log %338 : vector<72x1xf32>
    %c0_150 = arith.constant 0 : index
    %340 = memref.load %arg2[%c0_150] : memref<4xf32, #tpu.memory_space<smem>>
    %c1_151 = arith.constant 1 : index
    %341 = memref.load %arg2[%c1_151] : memref<4xf32, #tpu.memory_space<smem>>
    %c2_152 = arith.constant 2 : index
    %342 = memref.load %arg2[%c2_152] : memref<4xf32, #tpu.memory_space<smem>>
    %c3_153 = arith.constant 3 : index
    %343 = memref.load %arg2[%c3_153] : memref<4xf32, #tpu.memory_space<smem>>
    %c0_i32_154 = arith.constant 0 : i32
    %344 = vector.broadcast %c0_i32_154 : i32 to vector<72x4xi32>
    %345 = arith.cmpi eq, %316, %344 : vector<72x4xi32>
    %c1_i32_155 = arith.constant 1 : i32
    %346 = vector.broadcast %c1_i32_155 : i32 to vector<72x4xi32>
    %347 = arith.cmpi eq, %316, %346 : vector<72x4xi32>
    %c2_i32_156 = arith.constant 2 : i32
    %348 = vector.broadcast %c2_i32_156 : i32 to vector<72x4xi32>
    %349 = arith.cmpi eq, %316, %348 : vector<72x4xi32>
    %350 = vector.broadcast %342 : f32 to vector<72x4xf32>
    %351 = vector.broadcast %343 : f32 to vector<72x4xf32>
    %352 = arith.select %349, %350, %351 : vector<72x4xi1>, vector<72x4xf32>
    %353 = vector.broadcast %341 : f32 to vector<72x4xf32>
    %354 = arith.select %347, %353, %352 : vector<72x4xi1>, vector<72x4xf32>
    %355 = vector.broadcast %340 : f32 to vector<72x4xf32>
    %356 = arith.select %345, %355, %354 : vector<72x4xi1>, vector<72x4xf32>
    %357 = arith.mulf %321, %356 : vector<72x4xf32>
    %cst_157 = arith.constant dense<0.000000e+00> : vector<72xf32>
    %358 = vector.multi_reduction <add>, %357, %cst_157 [1] : vector<72x4xf32> to vector<72xf32>
    %359 = vector.shape_cast %358 : vector<72xf32> to vector<72x1xf32>
    %cst_158 = arith.constant 1.000000e+00 : f32
    %360 = vector.broadcast %cst_158 : f32 to vector<72x1xf32>
    %361 = arith.subf %360, %338 : vector<72x1xf32>
    %cst_159 = arith.constant 0.000000e+00 : f32
    %362 = vector.broadcast %cst_159 : f32 to vector<72x1xf32>
    %363 = arith.maximumf %361, %362 : vector<72x1xf32>
    %364 = arith.mulf %363, %363 : vector<72x1xf32>
    %cst_160 = arith.constant 0.000000e+00 : f32
    %365 = vector.broadcast %cst_160 : f32 to vector<72x1xf32>
    %366 = arith.subf %365, %359 : vector<72x1xf32>
    %367 = arith.mulf %366, %364 : vector<72x1xf32>
    %368 = arith.mulf %367, %339 : vector<72x1xf32>
    %369 = vector.shape_cast %368 : vector<72x1xf32> to vector<1x72x1xf32>
    %cst_161 = arith.constant dense<0.000000e+00> : vector<1xf32>
    %370 = vector.multi_reduction <add>, %369, %cst_161 [1, 2] : vector<1x72x1xf32> to vector<1xf32>
    %371 = vector.shape_cast %370 : vector<1xf32> to vector<1x1x1xf32>
    %372 = vector.extract %371[0, 0, 0] : f32 from vector<1x1x1xf32>
    %cst_162 = arith.constant 0.013888889 : f32
    %373 = arith.mulf %372, %cst_162 : f32
    %c0_163 = arith.constant 0 : index
    %c0_164 = arith.constant 0 : index
    %374 = memref.load %arg3[%c0_163, %c0_164] : memref<1x1xf32, #tpu.memory_space<smem>>
    memref.store %373, %arg3[%c0_163, %c0_164] : memref<1x1xf32, #tpu.memory_space<smem>>
    return
  }
}

</mosaic_0001>

<bundles_post_ra>
// kernel: type_loss_pallas.1
= control target key start
LH: loop header
LB: loop body
LE: loop exit
PB: predicated region body
PF: predicated region fallthrough
CT: control target
= control target key end

     0   :  { %8 = vsyncpa [#allocation4], 0  ;;  %s2295_s0 = inlined_call_operand.vmem [shape: s32[30], index: 0, kind: input, shape index: {}]   ;;  %s2296_s1 = inlined_call_operand.vmem [shape: f32[72,4], index: 1, kind: input, shape index: {}]   ;;  %s2297_s2 = inlined_call_operand.vmem [shape: f32[4], index: 2, kind: input, shape index: {}]   ;;  %s2298_s3 = inlined_call_operand.hbm [shape: f32[1,1], index: 3, kind: output, shape index: {}]  }
   0x1   :  { %9 = vsyncpa [#allocation6], 0 }
   0x2   :  { %10 = vsyncpa [#allocation3], 0  ;;  %s16_s14 = sshll.u32 %s2295_s0, 4  ;;  %s27_s17 = sshll.u32 %s2297_s2, 4  ;;  %s17_s14 = int_to_ptr.vmem [resolvable:$true] %s16_s14  ;;  %s28_s17 = int_to_ptr.vmem [resolvable:$true] %s27_s17 }
   0x3   :  { %s1155_s18 = smov [#allocation2]   ;;  %s1156_s19 = smov [#allocation5]  }
   0x4   :  { %19 = dma.vmem_to_smem %s17_s14, 16, %s1155_s18, [#allocation4]  }
   0x5   :  { %30 = dma.vmem_to_smem %s28_s17, 16, %s1156_s19, [#allocation6]  }
   0x6   :  { %1149 = dma.done.wait [#allocation4], 16  }
   0x7   :  { %1150 = vsyncadd [#allocation4], 4294967280 }
   0x8   :  { %1151 = dma.done.wait [#allocation6], 16  }
   0x9   :  { %1152 = vsyncadd [#allocation6], 4294967280 }
   0xa   :  { %39 = sfence }
   0xb   :  { %v1187_v0 = vld [vmem:[%s2296_s1 + $0x10] sm:$0xff]  ;;  %vm657_vm0 = vcmask 31744   ;;  %v1192_v1 = vld [vmem:[%s2296_s1] sm:$0xff]  ;;  %s1194_s2 = sld [smem:[#allocation2]]  ;;  %v1212_v6 = vld [vmem:[%s2296_s1 + $0x18] sm:$0xff]  ;;  %v40_v18 = vlaneseq }
   0xc   :  { %v664_v2 = vsel %vm657_vm0, %v1187_v0, -inf  ;;  %v658_v3 = vsel %vm657_vm0, %v1192_v1, -inf  ;;  %v1203_v4 = vld [vmem:[%s2296_s1 + $0x20] sm:$0xff]  ;;  %s1207_s25 = sld [smem:[#allocation2 + $0x1]]  ;;  %v1217_v7 = vld [vmem:[%s2296_s1 + $0x8] sm:$0xff]  ;;  %v667_v9 = vsel %vm657_vm0, %v1212_v6, -inf }
   0xd   :  { %665 = vmax.xlane.f32.xlu1 %v664_v2  ;;  %659 = vmax.xlane.f32.xlu0 %v658_v3  ;;  %v670_v5 = vsel %vm657_vm0, %v1203_v4, -inf  ;;  %s1219_s30 = sld [smem:[#allocation2 + $0x2]]  ;;  %v653_v8 = vld [vmem:[%s2296_s1 + $0x28] sm:$0xff]  ;;  %v661_v10 = vsel %vm657_vm0, %v1217_v7, -inf  ;;  %v1248_v12 = vld [vmem:[%s2296_s1 + $0x38] sm:$0xff]  ;;  %v1253_v13 = vld [vmem:[%s2296_s1 + $0x30] sm:$0xff] }
   0xe   :  { %671 = vmax.xlane.f32.xlu2 %v670_v5  ;;  %s1224_s6 = sld [smem:[#allocation2 + $0x3]]  ;;  %v673_v11 = vsel %vm657_vm0, %v653_v8, -inf  ;;  %v656_v14 = vld [vmem:[%s2296_s1 + $0x40] sm:$0xff]  ;;  %v679_v15 = vsel %vm657_vm0, %v1248_v12, -inf  ;;  %v676_v16 = vsel %vm657_vm0, %v1253_v13, -inf  ;;  %v1390_v19 = vshrl.u32 %v40_v18, 7 }
   0xf   :  { %s1227_s8 = sld [smem:[#allocation2 + $0x4]]  ;;  %v682_v17 = vsel %vm657_vm0, %v656_v14, -inf }
  0x10   :  { %s1233_s9 = sld [smem:[#allocation2 + $0x5]]  ;;  %v1402_v20 = vadd.s32 8, %v1390_v19  ;;  %v1529_v35 = vadd.s32 16, %v1390_v19  ;;  %v1597_v50 = vadd.s32 24, %v1390_v19  ;;  %v1660_v5 = vadd.s32 32, %v1390_v19 }
  0x11   :  { %s984_s7 = sshll.u32 %s1194_s2, 3  ;;  %s1236_s10 = sld [smem:[#allocation2 + $0x6]] }
  0x12   :  { %p70_p0 = scmp.lt.s32.totalorder %s1194_s2, %s1207_s25  ;;  %s72_s11 = sadd.s32 %s984_s7, %s1207_s25 }
  0x13   :  { %p53_p1 = scmp.eq.s32.totalorder %s1219_s30, 1  ;;  %p54_p2 = scmp.ge.s32.totalorder %s1219_s30, 14 }
  0x14   :  { %p55_p3 = scmp.le.s32.totalorder %s1219_s30, 26  ;;  %p59_p4 = scmp.ge.s32.totalorder %s1219_s30, 2 }
  0x15   :  { %668 = vmax.xlane.f32.xlu1 %v667_v9  ;;  %662 = vmax.xlane.f32.xlu0 %v661_v10  ;;  %p60_p5 = scmp.le.s32.totalorder %s1219_s30, 7  ;;  %p63_p6 = scmp.ge.s32.totalorder %s1219_s30, 8 }
  0x16   :  { %674 = vmax.xlane.f32.xlu2 %v673_v11  ;;  %p56_p7 = pnand %p55_p3, %p54_p2  ;;  %p64_p8 = scmp.le.s32.totalorder %s1219_s30, 13 }
  0x17   :  { %p1261_p9 = pnand %p60_p5, %p59_p4  ;;  %s985_s19 = sadd.s32 4294967295, %s72_s11 }
  0x18   :  { %p57_p10 = pneg %p56_p7  ;;  %p65_p11 = pnand %p64_p8, %p63_p6 }
  0x19   :  { %s2332_s19 = smov (!%p70_p0, %s985_s19), %s72_s11  ;;  %p75_p13 = scmp.eq.s32.totalorder %s1194_s2, %s1207_s25 }
  0x1a   :  { %p1275_p12 = por %p57_p10, %p53_p1  ;;  %p100_p0 = scmp.eq.s32.totalorder %s1233_s9, 1 }
  0x1b   :  { %s982_s21 = scalar_select %p65_p11, 1, 8 }
  0x1c   :  { %s2334_s19 = smov (%p75_p13, %s2332_s19), 4294967295  ;;  %p101_p1 = scmp.ge.s32.totalorder %s1233_s9, 14 }
  0x1d   :  { %680 = vmax.xlane.f32.xlu1 %v679_v15  ;;  %677 = vmax.xlane.f32.xlu0 %v676_v16  ;;  %s2336_s21 = smov (!%p1261_p9, %s982_s21), 4  ;;  %p102_p2 = scmp.le.s32.totalorder %s1233_s9, 26  ;;  %v1406_v21 = vstv %s2334_s19 }
  0x1e   :  { %683 = vmax.xlane.f32.xlu2 %v682_v17  ;;  %s69_s0 = scalar_select %p1275_p12, 2, %s2336_s21  ;;  %vm79_vm1 = vcmp.eq.s32.totalorder %v1402_v20, %v1406_v21  ;;  %vm78_vm4 = vcmp.eq.s32.totalorder %v1390_v19, %v1406_v21  ;;  %vm80_vm6 = vcmp.eq.s32.totalorder %v1529_v35, %v1406_v21  ;;  %vm81_vm13 = vcmp.eq.s32.totalorder %v1597_v50, %v1406_v21 }
  0x1f   :  { %p106_p3 = scmp.ge.s32.totalorder %s1233_s9, 2  ;;  %p107_p4 = scmp.le.s32.totalorder %s1233_s9, 7 }
  0x20   :  { %p110_p5 = scmp.ge.s32.totalorder %s1233_s9, 8  ;;  %p103_p6 = pnand %p102_p2, %p101_p1  ;;  %v1421_v22 = vstv %s69_s0 }
  0x21   :  { %p111_p7 = scmp.le.s32.totalorder %s1233_s9, 13  ;;  %p108_p8 = pnand %p107_p4, %p106_p3  ;;  %v89_v23 = vsel %vm79_vm1, %v1421_v22, 0  ;;  %v88_v36 = vsel %vm78_vm4, %v1421_v22, 0  ;;  %v90_v38 = vsel %vm80_vm6, %v1421_v22, 0  ;;  %v91_v57 = vsel %vm81_vm13, %v1421_v22, 0 }
  0x22   :  { %p117_p10 = scmp.lt.s32.totalorder %s1224_s6, %s1227_s8  ;;  %p104_p11 = pneg %p103_p6 }
  0x23   :  { %p112_p9 = pnand %p111_p7, %p110_p5  ;;  %s991_s22 = sshll.u32 %s1224_s6, 3 }
  0x24   :  { %p122_p13 = scmp.eq.s32.totalorder %s1224_s6, %s1227_s8  ;;  %p1304_p12 = por %p104_p11, %p100_p0 }
  0x25   :  { %s119_s23 = sadd.s32 %s991_s22, %s1227_s8  ;;  %s994_s26 = sld [smem:[#allocation2 + $0x7]] }
  0x26   :  { %s989_s24 = scalar_select %p112_p9, 1, 8 }
  0x27   :  { %s992_s25 = sadd.s32 4294967295, %s119_s23  ;;  %s995_s28 = sld [smem:[#allocation2 + $0x8]] }
  0x28   :  { %s2338_s24 = smov (!%p108_p8, %s989_s24), 4  ;;  %s2340_s25 = smov (!%p117_p10, %s992_s25), %s119_s23 }
  0x29   :  { %s116_s27 = scalar_select %p1304_p12, 2, %s2338_s24 }
  0x2a   :  { %s2342_s25 = smov (%p122_p13, %s2340_s25), 4294967295  ;;  %s998_s29 = sshll.u32 %s1236_s10, 3 }
  0x2b   :  { %p173_p1 = scmp.lt.s32.totalorder %s1236_s10, %s994_s26  ;;  %s175_s30 = sadd.s32 %s998_s29, %s994_s26  ;;  %v1439_v24 = vstv %s116_s27  ;;  %v1446_v25 = vstv %s2342_s25 }
  0x2c   :  { %s999_s4 = sadd.s32 4294967295, %s175_s30  ;;  %p178_p0 = scmp.eq.s32.totalorder %s1236_s10, %s994_s26  ;;  %v136_v26 = vor.u32 %v1439_v24, %v89_v23  ;;  %vm126_vm2 = vcmp.eq.s32.totalorder %v1402_v20, %v1446_v25  ;;  %v135_v37 = vor.u32 %v1439_v24, %v88_v36  ;;  %vm125_vm7 = vcmp.eq.s32.totalorder %v1390_v19, %v1446_v25 }
  0x2d   :  { %s2344_s4 = smov (!%p173_p1, %s999_s4), %s175_s30  ;;  %s1319_s5 = sld [smem:[#allocation2 + $0x9]]  ;;  %v137_v42 = vor.u32 %v1439_v24, %v90_v38  ;;  %vm127_vm8 = vcmp.eq.s32.totalorder %v1529_v35, %v1446_v25  ;;  %vm128_vm15 = vcmp.eq.s32.totalorder %v1597_v50, %v1446_v25  ;;  %v138_v60 = vor.u32 %v1439_v24, %v91_v57 }
  0x2e   :  { %s2346_s4 = smov (%p178_p0, %s2344_s4), 4294967295  ;;  %p156_p2 = scmp.eq.s32.totalorder %s995_s28, 1  ;;  %v145_v27 = vsel %vm126_vm2, %v136_v26, %v89_v23  ;;  %v144_v41 = vsel %vm125_vm7, %v135_v37, %v88_v36 }
  0x2f   :  { %p157_p3 = scmp.ge.s32.totalorder %s995_s28, 14  ;;  %p158_p4 = scmp.le.s32.totalorder %s995_s28, 26  ;;  %v1476_v29 = vstv %s2346_s4  ;;  %v146_v45 = vsel %vm127_vm8, %v137_v42, %v90_v38  ;;  %v147_v2 = vsel %vm128_vm15, %v138_v60, %v91_v57  ;;  %vm129_vm8 = vcmp.eq.s32.totalorder %v1660_v5, %v1446_v25 }
  0x30   :  { %p162_p5 = scmp.ge.s32.totalorder %s995_s28, 2  ;;  %p163_p6 = scmp.le.s32.totalorder %s995_s28, 7  ;;  %vm182_vm3 = vcmp.eq.s32.totalorder %v1402_v20, %v1476_v29  ;;  %vm181_vm9 = vcmp.eq.s32.totalorder %v1390_v19, %v1476_v29  ;;  %vm183_vm10 = vcmp.eq.s32.totalorder %v1529_v35, %v1476_v29  ;;  %vm184_vm4 = vcmp.eq.s32.totalorder %v1597_v50, %v1476_v29 }
  0x31   :  { %p166_p7 = scmp.ge.s32.totalorder %s995_s28, 8  ;;  %p159_p8 = pnand %p158_p4, %p157_p3 }
  0x32   :  { %p167_p10 = scmp.le.s32.totalorder %s995_s28, 13  ;;  %p164_p11 = pnand %p163_p6, %p162_p5 }
  0x33   :  { %s1323_s6 = sld [smem:[#allocation2 + $0xa]]  ;;  %p160_p9 = pneg %p159_p8 }
  0x34   :  { %p168_p13 = pnand %p167_p10, %p166_p7  ;;  %s1002_s7 = sld [smem:[#allocation2 + $0xb]] }
  0x35   :  { %s1005_s8 = sshll.u32 %s1319_s5, 3  ;;  %p1327_p1 = por %p160_p9, %p156_p2 }
  0x36   :  { %s1331_s10 = sld [smem:[#allocation2 + $0xc]] }
  0x37   :  { %s996_s11 = scalar_select %p168_p13, 1, 8 }
  0x38   :  { %s1333_s12 = sld [smem:[#allocation2 + $0xd]] }
  0x39   :  { %s2348_s11 = smov (!%p164_p11, %s996_s11), 4  ;;  %p229_p0 = scmp.lt.s32.totalorder %s1319_s5, %s1323_s6 }
  0x3a   :  { %s231_s13 = sadd.s32 %s1005_s8, %s1323_s6  ;;  %p212_p2 = scmp.eq.s32.totalorder %s1002_s7, 1 }
  0x3b   :  { %s172_s14 = scalar_select %p1327_p1, 2, %s2348_s11 }
  0x3c   :  { %p213_p3 = scmp.ge.s32.totalorder %s1002_s7, 14  ;;  %p214_p4 = scmp.le.s32.totalorder %s1002_s7, 26 }
  0x3d   :  { %p218_p5 = scmp.ge.s32.totalorder %s1002_s7, 2  ;;  %p219_p6 = scmp.le.s32.totalorder %s1002_s7, 7  ;;  %v1473_v28 = vstv %s172_s14 }
  0x3e   :  { %p222_p7 = scmp.ge.s32.totalorder %s1002_s7, 8  ;;  %p215_p8 = pnand %p214_p4, %p213_p3  ;;  %v192_v30 = vor.u32 %v1473_v28, %v145_v27  ;;  %v191_v43 = vor.u32 %v1473_v28, %v144_v41  ;;  %v193_v49 = vor.u32 %v1473_v28, %v146_v45  ;;  %v194_v9 = vor.u32 %v1473_v28, %v147_v2 }
  0x3f   :  { %p223_p10 = scmp.le.s32.totalorder %s1002_s7, 13  ;;  %p220_p11 = pnand %p219_p6, %p218_p5 }
  0x40   :  { %s1006_s15 = sadd.s32 4294967295, %s231_s13  ;;  %p216_p9 = pneg %p215_p8  ;;  %v201_v31 = vsel %vm182_vm3, %v192_v30, %v145_v27  ;;  %v200_v47 = vsel %vm181_vm9, %v191_v43, %v144_v41  ;;  %v202_v52 = vsel %vm183_vm10, %v193_v49, %v146_v45  ;;  %v203_v27 = vsel %vm184_vm4, %v194_v9, %v147_v2 }
  0x41   :  { %p224_p13 = pnand %p223_p10, %p222_p7  ;;  %s2350_s15 = smov (!%p229_p0, %s1006_s15), %s231_s13 }
  0x42   :  { %p1347_p1 = por %p216_p9, %p212_p2  ;;  %p234_p12 = scmp.eq.s32.totalorder %s1319_s5, %s1323_s6 }
  0x43   :  { %s1003_s17 = scalar_select %p224_p13, 1, 8 }
  0x44   :  { %s2352_s15 = smov (%p234_p12, %s2350_s15), 4294967295  ;;  %s1009_s18 = sld [smem:[#allocation2 + $0xe]] }
  0x45   :  { %s2354_s17 = smov (!%p220_p11, %s1003_s17), 4  ;;  %p285_p3 = scmp.lt.s32.totalorder %s1331_s10, %s1333_s12  ;;  %v1509_v33 = vstv %s2352_s15 }
  0x46   :  { %s228_s22 = scalar_select %p1347_p1, 2, %s2354_s17  ;;  %vm238_vm5 = vcmp.eq.s32.totalorder %v1402_v20, %v1509_v33  ;;  %vm237_vm12 = vcmp.eq.s32.totalorder %v1390_v19, %v1509_v33  ;;  %vm239_vm14 = vcmp.eq.s32.totalorder %v1529_v35, %v1509_v33  ;;  %vm240_vm6 = vcmp.eq.s32.totalorder %v1597_v50, %v1509_v33 }
  0x47   :  { %s1012_s23 = sshll.u32 %s1331_s10, 3  ;;  %p290_p4 = scmp.eq.s32.totalorder %s1331_s10, %s1333_s12  ;;  %vm241_vm13 = vcmp.eq.s32.totalorder %v1660_v5, %v1509_v33 }
  0x48   :  { %s287_s26 = sadd.s32 %s1012_s23, %s1333_s12  ;;  %s1366_s28 = sld [smem:[#allocation2 + $0xf]]  ;;  %v1502_v32 = vstv %s228_s22 }
  0x49   :  { %s1013_s29 = sadd.s32 4294967295, %s287_s26  ;;  %s1368_s30 = sld [smem:[#allocation2 + $0x10]]  ;;  %v248_v34 = vor.u32 %v1502_v32, %v201_v31  ;;  %v247_v48 = vor.u32 %v1502_v32, %v200_v47  ;;  %v249_v53 = vor.u32 %v1502_v32, %v202_v52 }
  0x4a   :  { %s2356_s29 = smov (!%p285_p3, %s1013_s29), %s287_s26  ;;  %p268_p12 = scmp.eq.s32.totalorder %s1009_s18, 1 }
  0x4b   :  { %p269_p0 = scmp.ge.s32.totalorder %s1009_s18, 14  ;;  %p270_p2 = scmp.le.s32.totalorder %s1009_s18, 26  ;;  %v257_v39 = vsel %vm238_vm5, %v248_v34, %v201_v31  ;;  %v256_v56 = vsel %vm237_vm12, %v247_v48, %v200_v47  ;;  %v258_v59 = vsel %vm239_vm14, %v249_v53, %v202_v52  ;;  %vm82_vm5 = vcmp.eq.s32.totalorder %v1660_v5, %v1406_v21 }
  0x4c   :  { %p274_p5 = scmp.ge.s32.totalorder %s1009_s18, 2  ;;  %p275_p6 = scmp.le.s32.totalorder %s1009_s18, 7  ;;  %v92_v16 = vsel %vm82_vm5, %v1421_v22, 0  ;;  %v250_v31 = vor.u32 %v1502_v32, %v203_v27  ;;  %vm185_vm12 = vcmp.eq.s32.totalorder %v1660_v5, %v1476_v29 }
  0x4d   :  { %p278_p7 = scmp.ge.s32.totalorder %s1009_s18, 8  ;;  %p271_p8 = pnand %p270_p2, %p269_p0  ;;  %v139_v26 = vor.u32 %v1439_v24, %v92_v16 }
  0x4e   :  { %p279_p10 = scmp.le.s32.totalorder %s1009_s18, 13  ;;  %p276_p11 = pnand %p275_p6, %p274_p5  ;;  %v259_v38 = vsel %vm240_vm6, %v250_v31, %v203_v27 }
  0x4f   :  { %s1370_s5 = sld [smem:[#allocation2 + $0x11]]  ;;  %p272_p9 = pneg %p271_p8  ;;  %v148_v34 = vsel %vm129_vm8, %v139_v26, %v92_v16 }
  0x50   :  { %p280_p13 = pnand %p279_p10, %p278_p7  ;;  %s2358_s29 = smov (%p290_p4, %s2356_s29), 4294967295  ;;  %v195_v37 = vor.u32 %v1473_v28, %v148_v34 }
  0x51   :  { %p1378_p3 = por %p272_p9, %p268_p12  ;;  %p341_p0 = scmp.lt.s32.totalorder %s1366_s28, %s1368_s30  ;;  %v1568_v44 = vstv %s2358_s29 }
  0x52   :  { %s1010_s7 = scalar_select %p280_p13, 1, 8  ;;  %vm294_vm11 = vcmp.eq.s32.totalorder %v1402_v20, %v1568_v44  ;;  %vm293_vm1 = vcmp.eq.s32.totalorder %v1390_v19, %v1568_v44  ;;  %vm295_vm3 = vcmp.eq.s32.totalorder %v1529_v35, %v1568_v44  ;;  %vm296_vm10 = vcmp.eq.s32.totalorder %v1597_v50, %v1568_v44 }
  0x53   :  { %s1019_s8 = sshll.u32 %s1366_s28, 3  ;;  %s1413_s23 = sld [smem:[#allocation2 + $0x12]]  ;;  %v204_v45 = vsel %vm185_vm12, %v195_v37, %v148_v34 }
  0x54   :  { %s2360_s7 = smov (!%p276_p11, %s1010_s7), 4  ;;  %s343_s13 = sadd.s32 %s1019_s8, %s1368_s30  ;;  %v251_v48 = vor.u32 %v1502_v32, %v204_v45 }
  0x55   :  { %p324_p4 = scmp.eq.s32.totalorder %s1370_s5, 1  ;;  %p325_p5 = scmp.ge.s32.totalorder %s1370_s5, 14 }
  0x56   :  { %s284_s10 = scalar_select %p1378_p3, 2, %s2360_s7  ;;  %v260_v53 = vsel %vm241_vm13, %v251_v48, %v204_v45 }
  0x57   :  { %p326_p12 = scmp.le.s32.totalorder %s1370_s5, 26  ;;  %p330_p6 = scmp.ge.s32.totalorder %s1370_s5, 2 }
  0x58   :  { %p331_p7 = scmp.le.s32.totalorder %s1370_s5, 7  ;;  %p334_p8 = scmp.ge.s32.totalorder %s1370_s5, 8  ;;  %v1555_v40 = vstv %s284_s10 }
  0x59   :  { %p327_p10 = pnand %p326_p12, %p325_p5  ;;  %p335_p11 = scmp.le.s32.totalorder %s1370_s5, 13  ;;  %v304_v46 = vor.u32 %v1555_v40, %v257_v39  ;;  %v303_v62 = vor.u32 %v1555_v40, %v256_v56  ;;  %v306_v41 = vor.u32 %v1555_v40, %v259_v38  ;;  %v307_v57 = vor.u32 %v1555_v40, %v260_v53 }
  0x5a   :  { %p1408_p9 = pnand %p331_p7, %p330_p6  ;;  %s1020_s18 = sadd.s32 4294967295, %s343_s13 }
  0x5b   :  { %p328_p13 = pneg %p327_p10  ;;  %p336_p2 = pnand %p335_p11, %p334_p8  ;;  %v313_v54 = vsel %vm294_vm11, %v304_v46, %v257_v39  ;;  %v312_v8 = vsel %vm293_vm1, %v303_v62, %v256_v56  ;;  %v1744_v46 = vadd.s32 40, %v1390_v19  ;;  %v315_v49 = vsel %vm296_vm10, %v306_v41, %v259_v38 }
  0x5c   :  { %s1429_s26 = sld [smem:[#allocation2 + $0x13]]  ;;  %s2362_s18 = smov (!%p341_p0, %s1020_s18), %s343_s13  ;;  %v1889_v41 = vand.u32 127, %v40_v18 }
  0x5d   :  { %p1425_p12 = por %p328_p13, %p324_p4  ;;  %p2312_p4 = scmp.eq.s32.totalorder %s1366_s28, %s1368_s30  ;;  %vm83_vm14 = vcmp.eq.s32.totalorder %v1744_v46, %v1406_v21  ;;  %vm130_vm4 = vcmp.eq.s32.totalorder %v1744_v46, %v1446_v25 }
  0x5e   :  { %s1017_s8 = scalar_select %p336_p2, 1, 8 }
  0x5f   :  { %s2366_s18 = smov (%p2312_p4, %s2362_s18), 4294967295  ;;  %s1457_s21 = sld [smem:[#allocation2 + $0x14]] }
  0x60   :  { %s2364_s8 = smov (!%p1408_p9, %s1017_s8), 4  ;;  %s1026_s0 = sshll.u32 %s1413_s23, 3  ;;  %v1634_v61 = vstv %s2366_s18 }
  0x61   :  { %s340_s20 = scalar_select %p1425_p12, 2, %s2364_s8  ;;  %vm350_vm2 = vcmp.eq.s32.totalorder %v1402_v20, %v1634_v61  ;;  %vm349_vm7 = vcmp.eq.s32.totalorder %v1390_v19, %v1634_v61  ;;  %vm351_vm9 = vcmp.eq.s32.totalorder %v1529_v35, %v1634_v61 }
  0x62   :  { %p397_p0 = scmp.lt.s32.totalorder %s1413_s23, %s1429_s26  ;;  %s399_s2 = sadd.s32 %s1026_s0, %s1429_s26 }
  0x63   :  { %s1465_s24 = sld [smem:[#allocation2 + $0x15]]  ;;  %s1027_s25 = sadd.s32 4294967295, %s399_s2  ;;  %v1619_v55 = vstv %s340_s20 }
  0x64   :  { %s1467_s27 = sld [smem:[#allocation2 + $0x16]]  ;;  %s2368_s25 = smov (!%p397_p0, %s1027_s25), %s399_s2  ;;  %v360_v63 = vor.u32 %v1619_v55, %v313_v54  ;;  %v359_v23 = vor.u32 %v1619_v55, %v312_v8 }
  0x65   :  { %s1480_s28 = sld [smem:[#allocation2 + $0x17]]  ;;  %p381_p10 = scmp.ge.s32.totalorder %s1457_s21, 14 }
  0x66   :  { %p382_p11 = scmp.le.s32.totalorder %s1457_s21, 26  ;;  %p386_p9 = scmp.ge.s32.totalorder %s1457_s21, 2  ;;  %v369_v10 = vsel %vm350_vm2, %v360_v63, %v313_v54  ;;  %v368_v39 = vsel %vm349_vm7, %v359_v23, %v312_v8  ;;  %v93_v54 = vsel %vm83_vm14, %v1421_v22, 0  ;;  %vm297_vm2 = vcmp.eq.s32.totalorder %v1660_v5, %v1568_v44 }
  0x67   :  { %p387_p13 = scmp.le.s32.totalorder %s1457_s21, 7  ;;  %p390_p5 = scmp.ge.s32.totalorder %s1457_s21, 8  ;;  %v140_v8 = vor.u32 %v1439_v24, %v93_v54  ;;  %vm353_vm7 = vcmp.eq.s32.totalorder %v1660_v5, %v1634_v61 }
  0x68   :  { %p383_p6 = pnand %p382_p11, %p381_p10  ;;  %p391_p4 = scmp.le.s32.totalorder %s1457_s21, 13 }
  0x69   :  { %p1492_p0 = pnand %p387_p13, %p386_p9  ;;  %p2316_p10 = scmp.eq.s32.totalorder %s1413_s23, %s1429_s26 }
  0x6a   :  { %p453_p2 = scmp.lt.s32.totalorder %s1465_s24, %s1467_s27  ;;  %p384_p8 = pneg %p383_p6 }
  0x6b   :  { %p1504_p7 = pnand %p391_p4, %p390_p5  ;;  %s2370_s25 = smov (%p2316_p10, %s2368_s25), 4294967295 }
  0x6c   :  { %p2317_p11 = scmp.eq.s32.totalorder %s1457_s21, 1  ;;  %p436_p1 = scmp.eq.s32.totalorder %s1480_s28, 1  ;;  %v1673_v14 = vstv %s2370_s25 }
  0x6d   :  { %s1024_s14 = scalar_select %p1504_p7, 1, 8  ;;  %vm406_vm11 = vcmp.eq.s32.totalorder %v1402_v20, %v1673_v14  ;;  %vm405_vm15 = vcmp.eq.s32.totalorder %v1390_v19, %v1673_v14  ;;  %vm407_vm1 = vcmp.eq.s32.totalorder %v1529_v35, %v1673_v14  ;;  %vm408_vm10 = vcmp.eq.s32.totalorder %v1597_v50, %v1673_v14 }
  0x6e   :  { %p1518_p9 = por %p384_p8, %p2317_p11  ;;  %p437_p8 = scmp.ge.s32.totalorder %s1480_s28, 14 }
  0x6f   :  { %p438_p13 = scmp.le.s32.totalorder %s1480_s28, 26  ;;  %s2372_s14 = smov (!%p1492_p0, %s1024_s14), 4 }
  0x70   :  { %p442_p5 = scmp.ge.s32.totalorder %s1480_s28, 2  ;;  %p443_p4 = scmp.le.s32.totalorder %s1480_s28, 7 }
  0x71   :  { %p1543_p7 = pnand %p438_p13, %p437_p8  ;;  %p446_p3 = scmp.ge.s32.totalorder %s1480_s28, 8 }
  0x72   :  { %s396_s16 = scalar_select %p1518_p9, 2, %s2372_s14 }
  0x73   :  { %p440_p6 = pneg %p1543_p7  ;;  %p447_p0 = scmp.le.s32.totalorder %s1480_s28, 13 }
  0x74   :  { %p1583_p11 = pnand %p443_p4, %p442_p5  ;;  %s1033_s30 = sshll.u32 %s1465_s24, 3  ;;  %v1679_v15 = vstv %s396_s16 }
  0x75   :  { %p1577_p10 = por %p440_p6, %p436_p1  ;;  %p1587_p8 = pnand %p447_p0, %p446_p3  ;;  %v416_v36 = vor.u32 %v1679_v15, %v369_v10 }
  0x76   :  { %s455_s5 = sadd.s32 %s1033_s30, %s1467_s27  ;;  %p458_p1 = scmp.eq.s32.totalorder %s1465_s24, %s1467_s27 }
  0x77   :  { %s1031_s6 = scalar_select %p1587_p8, 1, 8 }
  0x78   :  { %s1034_s7 = sadd.s32 4294967295, %s455_s5  ;;  %s1610_s10 = sld [smem:[#allocation2 + $0x18]] }
  0x79   :  { %s2374_s6 = smov (!%p1583_p11, %s1031_s6), 4  ;;  %s2376_s7 = smov (!%p453_p2, %s1034_s7), %s455_s5 }
  0x7a   :  { %s452_s12 = scalar_select %p1577_p10, 2, %s2374_s6 }
  0x7b   :  { %s2378_s7 = smov (%p458_p1, %s2376_s7), 4294967295  ;;  %s1646_s13 = sld [smem:[#allocation2 + $0x19]] }
  0x7c   :  { %s1653_s18 = sld [smem:[#allocation2 + $0x1a]]  ;;  %v1788_v56 = vstv %s452_s12 }
  0x7d   :  { %s1657_s23 = sld [smem:[#allocation2 + $0x1b]] }
  0x7e   :  { %s1040_s19 = sshll.u32 %s1610_s10, 3  ;;  %s1663_s26 = sld [smem:[#allocation2 + $0x1c]] }
  0x7f   :  { %s1668_s8 = sld [smem:[#allocation2 + $0x1d]] }
  0x80   :  { %v660_v51 = vpop.xlane.xlu0 %659  ;;  %s1681_s20 = sld [smem:[#allocation5]]  ;;  %v1684_v17 = vpop.xlane.xlu1 %665 }
  0x81   :  { %v685_v58 = vsub.f32 %v1192_v1, %v660_v51  ;;  %v305_v1 = vor.u32 %v1555_v40, %v258_v59  ;;  %p509_p12 = scmp.lt.s32.totalorder %s1610_s10, %s1646_s13  ;;  %s1689_s21 = sadd.s32 %s1040_s19, %s1646_s13  ;;  %v687_v47 = vsub.f32 %v1187_v0, %v1684_v17  ;;  %v425_v0 = vsel %vm406_vm11, %v416_v36, %v369_v10 }
  0x82   :  { %p492_p2 = scmp.eq.s32.totalorder %s1653_s18, 1  ;;  %p493_p9 = scmp.ge.s32.totalorder %s1653_s18, 14  ;;  %v415_v51 = vor.u32 %v1679_v15, %v368_v39  ;;  %v472_v9 = vor.u32 %v1788_v56, %v425_v0  ;;  %v1862_v36 = vadd.s32 48, %v1390_v19  ;;  %vm186_vm11 = vcmp.eq.s32.totalorder %v1744_v46, %v1476_v29 }
  0x83   :  { %v694_v3 = vmul.f32 1.442695, %v685_v58  ;;  %v314_v11 = vsel %vm295_vm3, %v305_v1, %v258_v59  ;;  %p494_p13 = scmp.le.s32.totalorder %s1653_s18, 26  ;;  %p498_p7 = scmp.ge.s32.totalorder %s1653_s18, 2  ;;  %v362_v58 = vor.u32 %v1619_v55, %v315_v49  ;;  %v1797_v59 = vstv %s2378_s7 }
  0x84   :  { %v361_v30 = vor.u32 %v1619_v55, %v314_v11  ;;  %p499_p5 = scmp.le.s32.totalorder %s1653_s18, 7  ;;  %p502_p6 = scmp.ge.s32.totalorder %s1653_s18, 8  ;;  %vm352_vm3 = vcmp.eq.s32.totalorder %v1597_v50, %v1634_v61  ;;  %v424_v2 = vsel %vm405_vm15, %v415_v51, %v368_v39  ;;  %vm462_vm5 = vcmp.eq.s32.totalorder %v1402_v20, %v1797_v59 }
  0x85   :  { %1057 = vpow2.f32 %v694_v3  ;;  %p1720_p4 = pnand %p494_p13, %p493_p9  ;;  %p503_p3 = scmp.le.s32.totalorder %s1653_s18, 13  ;;  %v316_v3 = vsel %vm297_vm2, %v307_v57, %v260_v53  ;;  %v371_v16 = vsel %vm352_vm3, %v362_v58, %v315_v49  ;;  %v698_v17 = vmul.f32 1.442695, %v687_v47 }
  0x86   :  { %p1735_p0 = pnand %p499_p5, %p498_p7  ;;  %s1041_s24 = sadd.s32 4294967295, %s1689_s21  ;;  %v370_v43 = vsel %vm351_vm9, %v361_v30, %v314_v11  ;;  %v363_v10 = vor.u32 %v1619_v55, %v316_v3  ;;  %vm461_vm6 = vcmp.eq.s32.totalorder %v1390_v19, %v1797_v59  ;;  %v471_v23 = vor.u32 %v1788_v56, %v424_v2 }
  0x87   :  { %p496_p11 = pneg %p1720_p4  ;;  %p1752_p8 = pnand %p503_p3, %p502_p6  ;;  %v417_v52 = vor.u32 %v1679_v15, %v370_v43  ;;  %v149_v30 = vsel %vm130_vm4, %v140_v8, %v93_v54  ;;  %v481_v31 = vsel %vm462_vm5, %v472_v9, %v425_v0  ;;  %vm463_vm8 = vcmp.eq.s32.totalorder %v1529_v35, %v1797_v59 }
  0x88   :  { %s2380_s24 = smov (!%p509_p12, %s1041_s24), %s1689_s21  ;;  %p514_p9 = scmp.eq.s32.totalorder %s1610_s10, %s1646_s13  ;;  %v669_v60 = vpop.xlane.xlu1 %668  ;;  %v1801_v62 = vpop.xlane.xlu0 %662  ;;  %v372_v27 = vsel %vm353_vm7, %v363_v10, %v316_v3  ;;  %v418_v34 = vor.u32 %v1679_v15, %v371_v16  ;;  %vm409_vm9 = vcmp.eq.s32.totalorder %v1660_v5, %v1673_v14  ;;  %v196_v38 = vor.u32 %v1473_v28, %v149_v30 }
  0x89   :  { %p1774_p1 = por %p496_p11, %p492_p2  ;;  %v688_v1 = vsub.f32 %v1212_v6, %v669_v60  ;;  %p548_p10 = scmp.eq.s32.totalorder %s1668_s8, 1  ;;  %v426_v6 = vsel %vm407_vm1, %v417_v52, %v370_v43  ;;  %v419_v37 = vor.u32 %v1679_v15, %v372_v27  ;;  %v480_v43 = vsel %vm461_vm6, %v471_v23, %v424_v2 }
  0x8a   :  { %s1038_s28 = scalar_select %p1752_p8, 1, 8  ;;  %v473_v26 = vor.u32 %v1788_v56, %v426_v6  ;;  %v686_v47 = vsub.f32 %v1217_v7, %v1801_v62  ;;  %v427_v7 = vsel %vm408_vm10, %v418_v34, %v371_v16  ;;  %vm84_vm12 = vcmp.eq.s32.totalorder %v1862_v36, %v1406_v21 }
  0x8b   :  { %v1731_v42 = vpop.eup %1057  ;;  %s2382_s24 = smov (%p514_p9, %s2380_s24), 4294967295  ;;  %p549_p12 = scmp.ge.s32.totalorder %s1668_s8, 14  ;;  %v700_v11 = vmul.f32 1.442695, %v688_v1  ;;  %v428_v49 = vsel %vm409_vm9, %v419_v37, %v372_v27  ;;  %vm465_vm13 = vcmp.eq.s32.totalorder %v1660_v5, %v1797_v59  ;;  %v841_v60 = vstv %s1681_s20 }
  0x8c   :  { %v712_v63 = vsel %vm657_vm0, %v1731_v42, 0.0  ;;  %s2384_s28 = smov (!%p1735_p0, %s1038_s28), 4  ;;  %p550_p2 = scmp.le.s32.totalorder %s1668_s8, 26  ;;  %v1897_v45 = vstv %s2382_s24  ;;  %v482_v18 = vsel %vm463_vm8, %v473_v26, %v426_v6  ;;  %v475_v51 = vor.u32 %v1788_v56, %v428_v49 }
  0x8d   :  { %713 = vadd.xlane.f32.xlu0 %v712_v63  ;;  %s2386_s28 = smov (%p1774_p1, %s2384_s28), 2  ;;  %p554_p13 = scmp.ge.s32.totalorder %s1668_s8, 2  ;;  %1059 = vpow2.f32 %v700_v11  ;;  %vm518_vm14 = vcmp.eq.s32.totalorder %v1402_v20, %v1897_v45  ;;  %vm517_vm15 = vcmp.eq.s32.totalorder %v1390_v19, %v1897_v45  ;;  %v696_v62 = vmul.f32 1.442695, %v686_v47  ;;  %v672_v63 = vpop.xlane.xlu2 %671 }
  0x8e   :  { %p555_p7 = scmp.le.s32.totalorder %s1668_s8, 7  ;;  %p558_p5 = scmp.ge.s32.totalorder %s1668_s8, 8  ;;  %v1878_v39 = vstv %s2386_s28  ;;  %1061 = vpow2.f32 %v698_v17  ;;  %v1950_v1 = vsel %vm84_vm12, %v1421_v22, 0  ;;  %vm835_vm1 = vcmp.eq.s32.totalorder %v1889_v41, 2 }
  0x8f   :  { %p1853_p6 = pnand %p550_p2, %p549_p12  ;;  %p559_p4 = scmp.le.s32.totalorder %s1668_s8, 13  ;;  %v528_v53 = vor.u32 %v1878_v39, %v481_v31  ;;  %v527_v54 = vor.u32 %v1878_v39, %v480_v43  ;;  %v529_v2 = vor.u32 %v1878_v39, %v482_v18  ;;  %v484_v3 = vsel %vm465_vm13, %v475_v51, %v428_v49 }
  0x90   :  { %p1866_p3 = pnand %p555_p7, %p554_p13  ;;  %p565_p0 = scmp.lt.s32.totalorder %s1657_s23, %s1663_s26  ;;  %v678_v48 = vpop.xlane.xlu0 %677  ;;  %v474_v8 = vor.u32 %v1788_v56, %v427_v7  ;;  %vm834_vm2 = vcmp.eq.s32.totalorder %v1889_v41, 1  ;;  %vm242_vm3 = vcmp.eq.s32.totalorder %v1744_v46, %v1509_v33  ;;  %vm131_vm4 = vcmp.eq.s32.totalorder %v1862_v36, %v1446_v25  ;;  %v681_v23 = vpop.xlane.xlu1 %680 }
  0x91   :  { %p552_p11 = pneg %p1853_p6  ;;  %p1884_p8 = pnand %p559_p4, %p558_p5  ;;  %v691_v0 = vsub.f32 %v1253_v13, %v678_v48  ;;  %v205_v13 = vsel %vm186_vm11, %v196_v38, %v149_v30  ;;  %v537_v6 = vsel %vm518_vm14, %v528_v53, %v481_v31  ;;  %v536_v10 = vsel %vm517_vm15, %v527_v54, %v480_v43 }
  0x92   :  { %s1047_s14 = sshll.u32 %s1657_s23, 3  ;;  %p570_p1 = scmp.eq.s32.totalorder %s1657_s23, %s1663_s26  ;;  %v252_v9 = vor.u32 %v1502_v32, %v205_v13  ;;  %vm833_vm5 = vcmp.eq.s32.totalorder %v1889_v41, 0  ;;  %v689_v11 = vsub.f32 %v1203_v4, %v672_v63  ;;  %vm519_vm6 = vcmp.eq.s32.totalorder %v1529_v35, %v1897_v45 }
  0x93   :  { %p1912_p9 = por %p552_p11, %p548_p10  ;;  %s567_s16 = sadd.s32 %s1047_s14, %s1663_s26  ;;  %v1924_v52 = vpop.eup %1059  ;;  %v706_v57 = vmul.f32 1.442695, %v691_v0  ;;  %vm464_vm7 = vcmp.eq.s32.totalorder %v1597_v50, %v1797_v59  ;;  %v141_v16 = vor.u32 %v1439_v24, %v1950_v1  ;;  %vm521_vm8 = vcmp.eq.s32.totalorder %v1660_v5, %v1897_v45 }
  0x94   :  { %s1045_s17 = scalar_select %p1884_p8, 1, 8  ;;  %v721_v58 = vsel %vm657_vm0, %v1924_v52, 0.0  ;;  %v531_v4 = vor.u32 %v1878_v39, %v484_v3  ;;  %v261_v31 = vsel %vm242_vm3, %v252_v9, %v205_v13  ;;  %v2002_v34 = vpop.eup %1061  ;;  %v538_v37 = vsel %vm519_vm6, %v529_v2, %v482_v18 }
  0x95   :  { %s1048_s22 = sadd.s32 4294967295, %s567_s16  ;;  %s1937_s29 = sld [smem:[#allocation5 + $0x1]]  ;;  %722 = vadd.xlane.f32.xlu0 %v721_v58  ;;  %1063 = vpow2.f32 %v706_v57  ;;  %v2014_v38 = vsel %vm464_vm7, %v474_v8, %v427_v7  ;;  %v702_v48 = vmul.f32 1.442695, %v689_v11  ;;  %v692_v49 = vsub.f32 %v1248_v12, %v681_v23  ;;  %v675_v63 = vpop.xlane.xlu2 %674 }
  0x96   :  { %s2388_s17 = smov (!%p1866_p3, %s1045_s17), 4  ;;  %s2390_s22 = smov (!%p565_p0, %s1048_s22), %s567_s16  ;;  %1065 = vpow2.f32 %v696_v62  ;;  %v540_v18 = vsel %vm521_vm8, %v531_v4, %v484_v3  ;;  %v308_v0 = vor.u32 %v1555_v40, %v261_v31  ;;  %vm520_vm13 = vcmp.eq.s32.totalorder %v1597_v50, %v1897_v45 }
  0x97   :  { %s2392_s17 = smov (%p1912_p9, %s2388_s17), 2  ;;  %s2394_s22 = smov (%p570_p1, %s2390_s22), 4294967295  ;;  %vm298_vm14 = vcmp.eq.s32.totalorder %v1744_v46, %v1568_v44  ;;  %1067 = vpow2.f32 %v702_v48  ;;  %vm354_vm3 = vcmp.eq.s32.totalorder %v1744_v46, %v1634_v61  ;;  %vm243_vm7 = vcmp.eq.s32.totalorder %v1862_v36, %v1509_v33 }
  0x98   :  { %v1986_v17 = vstv %s2392_s17  ;;  %s1988_s30 = sld [smem:[#allocation5 + $0x2]]  ;;  %v1993_v26 = vstv %s2394_s22  ;;  %vm466_vm8 = vcmp.eq.s32.totalorder %v1744_v46, %v1797_v59  ;;  %s968_s18 = sshll.u32 %s2298_s3, 4  ;;  %s969_s18 = int_to_ptr.hbm [resolvable:$true] %s968_s18 }
  0x99   :  { %v584_v27 = vor.u32 %v1986_v17, %v537_v6  ;;  %s1996_s5 = sld [smem:[#allocation5 + $0x3]]  ;;  %v583_v30 = vor.u32 %v1986_v17, %v536_v10  ;;  %vm574_vm9 = vcmp.eq.s32.totalorder %v1402_v20, %v1993_v26  ;;  %vm573_vm10 = vcmp.eq.s32.totalorder %v1390_v19, %v1993_v26  ;;  %s1157_s26 = smov [#allocation7]  }
  0x9a   :  { %vm577_vm15 = vcmp.eq.s32.totalorder %v1660_v5, %v1993_v26  ;;  %v587_v2 = vor.u32 %v1986_v17, %v540_v18  ;;  %v585_v11 = vor.u32 %v1986_v17, %v538_v37  ;;  %v150_v5 = vsel %vm131_vm4, %v141_v16, %v1950_v1 }
  0x9b   :  { %v593_v43 = vsel %vm574_vm9, %v584_v27, %v537_v6  ;;  %v592_v47 = vsel %vm573_vm10, %v583_v30, %v536_v10  ;;  %v2017_v20 = vpop.eup %1063  ;;  %v839_v57 = vstv %s1937_s29  ;;  %v317_v6 = vsel %vm298_vm14, %v308_v0, %v261_v31 }
  0x9c   :  { %vm602_vm11 = vcmp.eq.s32.totalorder %v593_v43, 0  ;;  %vm601_vm12 = vcmp.eq.s32.totalorder %v592_v47, 0  ;;  %v730_v53 = vsel %vm657_vm0, %v2017_v20, 0.0  ;;  %v1066_v12 = vpop.eup %1065  ;;  %v596_v23 = vsel %vm577_vm15, %v587_v2, %v540_v18 }
  0x9d   :  { %v611_v51 = vsel %vm602_vm11, 1, %v593_v43  ;;  %v610_v7 = vsel %vm601_vm12, 1, %v592_v47  ;;  %731 = vadd.xlane.f32.xlu0 %v730_v53  ;;  %v708_v31 = vmul.f32 1.442695, %v692_v49  ;;  %v530_v43 = vor.u32 %v1878_v39, %v2014_v38  ;;  %v1068_v48 = vpop.eup %1067 }
  0x9e   :  { %v622_v54 = vshra.s32 %v611_v51, %v1889_v41  ;;  %v836_v13 = vstv %s1988_s30  ;;  %v621_v58 = vshra.s32 %v610_v7, %v1889_v41  ;;  %v364_v47 = vor.u32 %v1619_v55, %v317_v6 }
  0x9f   :  { %v837_v62 = vstv %s1996_s5  ;;  %vm187_vm4 = vcmp.eq.s32.totalorder %v1862_v36, %v1476_v29  ;;  %1069 = vpow2.f32 %v708_v31  ;;  %vm299_vm9 = vcmp.eq.s32.totalorder %v1862_v36, %v1568_v44 }
  0xa0   :  { %v631_v3 = vand.u32 1, %v622_v54  ;;  %v838_v8 = vsel %vm835_vm1, %v836_v13, %v837_v62  ;;  %v2039_v9 = vand.u32 1, %v621_v58  ;;  %vm575_vm1 = vcmp.eq.s32.totalorder %v1529_v35, %v1993_v26  ;;  %v1111_v35 = vld [vmem:[%s2296_s1 + $0x28] sm:$0xff] }
  0xa1   :  { %v840_v10 = vsel %vm834_vm2, %v839_v57, %v838_v8  ;;  %vm605_vm2 = vcmp.eq.s32.totalorder %v596_v23, 0  ;;  %v690_v49 = vsub.f32 %v1111_v35, %v675_v63  ;;  %v594_v0 = vsel %vm575_vm1, %v585_v11, %v538_v37 }
  0xa2   :  { %v640_v4 = vcvt.s32.f32 %v631_v3  ;;  %v2052_v27 = vsel %vm833_vm5, %v841_v60, %v840_v10  ;;  %v639_v30 = vcvt.s32.f32 %v2039_v9  ;;  %v197_v60 = vor.u32 %v1473_v28, %v150_v5  ;;  %v684_v3 = vpop.xlane.xlu2 %683 }
  0xa3   :  { %v614_v51 = vsel %vm605_vm2, 1, %v596_v23  ;;  %v718_v13 = vsel %vm657_vm0, %v2002_v34, 0.0  ;;  %v373_v37 = vsel %vm354_vm3, %v364_v47, %v317_v6  ;;  %vm410_vm5 = vcmp.eq.s32.totalorder %v1744_v46, %v1673_v14 }
  0xa4   :  { %v844_v1 = vmul.f32 %v2052_v27, %v640_v4  ;;  %v843_v16 = vmul.f32 %v2052_v27, %v639_v30  ;;  %v740_v18 = vmul.f32 %v1066_v12, %v640_v4  ;;  %v625_v54 = vshra.s32 %v614_v51, %v1889_v41 }
  0xa5   :  { %vm603_vm6 = vcmp.eq.s32.totalorder %v594_v0, 0  ;;  %v539_v62 = vsel %vm520_vm13, %v530_v43, %v2014_v38  ;;  %v420_v63 = vor.u32 %v1679_v15, %v373_v37  ;;  %v704_v2 = vmul.f32 1.442695, %v690_v49  ;;  %v2116_v49 = vpop.eup %1069 }
  0xa6   :  { %v855_v7 = vsel %vm657_vm0, %v844_v1, 0.0  ;;  %v852_v53 = vsel %vm657_vm0, %v843_v16, 0.0  ;;  %v751_v57 = vsel %vm657_vm0, %v740_v18, 0.0  ;;  %v2083_v58 = vand.u32 1, %v625_v54 }
  0xa7   :  { %856 = vadd.xlane.f32.xlu2 %v855_v7  ;;  %853 = vadd.xlane.f32.xlu1 %v852_v53  ;;  %v206_v8 = vsel %vm187_vm4, %v197_v60, %v150_v5  ;;  %v429_v10 = vsel %vm410_vm5, %v420_v63, %v373_v37  ;;  %v715_v23 = vsel %vm657_vm0, %v1066_v12, 0.0  ;;  %v724_v38 = vsel %vm657_vm0, %v1068_v48, 0.0  ;;  %v1112_v5 = vld [vmem:[%s2296_s1 + $0x40] sm:$0xff] }
  0xa8   :  { %752 = vadd.xlane.f32.xlu0 %v751_v57  ;;  %v643_v6 = vcvt.s32.f32 %v2083_v58  ;;  %v253_v11 = vor.u32 %v1502_v32, %v206_v8  ;;  %v612_v4 = vsel %vm603_vm6, 1, %v594_v0  ;;  %v476_v31 = vor.u32 %v1788_v56, %v429_v10 }
  0xa9   :  { %v693_v43 = vsub.f32 %v1112_v5, %v684_v3  ;;  %1071 = vpow2.f32 %v704_v2  ;;  %vm522_vm10 = vcmp.eq.s32.totalorder %v1744_v46, %v1897_v45  ;;  %v623_v60 = vshra.s32 %v612_v4, %v1889_v41 }
  0xaa   :  { %v743_v47 = vmul.f32 %v1068_v48, %v643_v6  ;;  %v262_v1 = vsel %vm243_vm7, %v253_v11, %v206_v8  ;;  %v485_v16 = vsel %vm466_vm8, %v476_v31, %v429_v10  ;;  %vm576_vm11 = vcmp.eq.s32.totalorder %v1597_v50, %v1993_v26 }
  0xab   :  { %v309_v12 = vor.u32 %v1555_v40, %v262_v1  ;;  %v532_v35 = vor.u32 %v1878_v39, %v485_v16  ;;  %v2114_v48 = vadd.s32 64, %v1390_v19  ;;  %v586_v0 = vor.u32 %v1986_v17, %v539_v62 }
  0xac   :  { %v760_v18 = vsel %vm657_vm0, %v743_v47, 0.0  ;;  %vm355_vm12 = vcmp.eq.s32.totalorder %v1862_v36, %v1634_v61  ;;  %v710_v7 = vmul.f32 1.442695, %v693_v43  ;;  %vm578_vm14 = vcmp.eq.s32.totalorder %v1744_v46, %v1993_v26 }
  0xad   :  { %v318_v51 = vsel %vm299_vm9, %v309_v12, %v262_v1  ;;  %v541_v53 = vsel %vm522_vm10, %v532_v35, %v485_v16  ;;  %vm86_vm13 = vcmp.eq.s32.totalorder %v2114_v48, %v1406_v21  ;;  %vm133_vm15 = vcmp.eq.s32.totalorder %v2114_v48, %v1446_v25 }
  0xae   :  { %v365_v54 = vor.u32 %v1619_v55, %v318_v51  ;;  %v96_v57 = vsel %vm86_vm13, %v1421_v22, 0  ;;  %vm411_vm1 = vcmp.eq.s32.totalorder %v1862_v36, %v1673_v14  ;;  %v2135_v2 = vadd.s32 56, %v1390_v19 }
  0xaf   :  { %719 = vadd.xlane.f32.xlu2 %v718_v13  ;;  %716 = vadd.xlane.f32.xlu1 %v715_v23  ;;  %v588_v13 = vor.u32 %v1986_v17, %v541_v53  ;;  %v143_v63 = vor.u32 %v1439_v24, %v96_v57  ;;  %v2137_v3 = vpop.eup %1071  ;;  %v733_v8 = vsel %vm657_vm0, %v2116_v49, 0.0  ;;  %v2141_v10 = vand.u32 1, %v623_v60 }
  0xb0   :  { %761 = vadd.xlane.f32.xlu0 %v760_v18  ;;  %v374_v37 = vsel %vm355_vm12, %v365_v54, %v318_v51  ;;  %v595_v11 = vsel %vm576_vm11, %v586_v0, %v539_v62  ;;  %1073 = vpow2.f32 %v710_v7  ;;  %v739_v4 = vmul.f32 %v1731_v42, %v639_v30 }
  0xb1   :  { %v421_v23 = vor.u32 %v1679_v15, %v374_v37  ;;  %v152_v19 = vsel %vm133_vm15, %v143_v63, %v96_v57  ;;  %vm189_vm2 = vcmp.eq.s32.totalorder %v2114_v48, %v1476_v29  ;;  %v597_v31 = vsel %vm578_vm14, %v588_v13, %v541_v53 }
  0xb2   :  { %vm467_vm3 = vcmp.eq.s32.totalorder %v1862_v36, %v1797_v59  ;;  %v199_v50 = vor.u32 %v1473_v28, %v152_v19  ;;  %vm604_vm4 = vcmp.eq.s32.totalorder %v595_v11, 0  ;;  %vm523_vm5 = vcmp.eq.s32.totalorder %v1862_v36, %v1897_v45 }
  0xb3   :  { %v430_v5 = vsel %vm411_vm1, %v421_v23, %v374_v37  ;;  %vm85_vm6 = vcmp.eq.s32.totalorder %v2135_v2, %v1406_v21  ;;  %vm245_vm7 = vcmp.eq.s32.totalorder %v2114_v48, %v1509_v33  ;;  %vm132_vm8 = vcmp.eq.s32.totalorder %v2135_v2, %v1446_v25 }
  0xb4   :  { %v477_v62 = vor.u32 %v1788_v56, %v430_v5  ;;  %v208_v42 = vsel %vm189_vm2, %v199_v50, %v152_v19  ;;  %v95_v46 = vsel %vm85_vm6, %v1421_v22, 0  ;;  %vm606_vm9 = vcmp.eq.s32.totalorder %v597_v31, 0 }
  0xb5   :  { %v255_v30 = vor.u32 %v1502_v32, %v208_v42  ;;  %v142_v43 = vor.u32 %v1439_v24, %v95_v46  ;;  %v641_v47 = vcvt.s32.f32 %v2141_v10  ;;  %v613_v21 = vsel %vm604_vm4, 1, %v595_v11 }
  0xb6   :  { %v486_v9 = vsel %vm467_vm3, %v477_v62, %v430_v5  ;;  %vm579_vm10 = vcmp.eq.s32.totalorder %v1862_v36, %v1993_v26  ;;  %v2174_v1 = vpop.eup %1073  ;;  %vm301_vm11 = vcmp.eq.s32.totalorder %v2114_v48, %v1568_v44  ;;  %vm188_vm12 = vcmp.eq.s32.totalorder %v2135_v2, %v1476_v29 }
  0xb7   :  { %725 = vadd.xlane.f32.xlu1 %v724_v38  ;;  %734 = vadd.xlane.f32.xlu2 %v733_v8  ;;  %v533_v38 = vor.u32 %v1878_v39, %v486_v9  ;;  %v264_v22 = vsel %vm245_vm7, %v255_v30, %v208_v42  ;;  %v151_v25 = vsel %vm132_vm8, %v142_v43, %v95_v46  ;;  %v615_v16 = vsel %vm606_vm9, 1, %v597_v31 }
  0xb8   :  { %v311_v12 = vor.u32 %v1555_v40, %v264_v22  ;;  %v198_v60 = vor.u32 %v1473_v28, %v151_v25  ;;  %v727_v35 = vsel %vm657_vm0, %v2137_v3, 0.0  ;;  %v748_v18 = vsel %vm657_vm0, %v739_v4, 0.0 }
  0xb9   :  { %v542_v24 = vsel %vm523_vm5, %v533_v38, %v486_v9  ;;  %v624_v0 = vshra.s32 %v613_v21, %v1889_v41  ;;  %vm357_vm13 = vcmp.eq.s32.totalorder %v2114_v48, %v1634_v61  ;;  %vm244_vm14 = vcmp.eq.s32.totalorder %v2135_v2, %v1509_v33 }
  0xba   :  { %v589_v51 = vor.u32 %v1986_v17, %v542_v24  ;;  %v320_v7 = vsel %vm301_vm11, %v311_v12, %v264_v22  ;;  %v207_v29 = vsel %vm188_vm12, %v198_v60, %v151_v25  ;;  %v626_v53 = vshra.s32 %v615_v16, %v1889_v41 }
  0xbb   :  { %v367_v54 = vor.u32 %v1619_v55, %v320_v7  ;;  %v254_v13 = vor.u32 %v1502_v32, %v207_v29  ;;  %v741_v57 = vmul.f32 %v2002_v34, %v641_v47  ;;  %vm413_vm1 = vcmp.eq.s32.totalorder %v2114_v48, %v1673_v14 }
  0xbc   :  { %v598_v28 = vsel %vm579_vm10, %v589_v51, %v542_v24  ;;  %vm300_vm2 = vcmp.eq.s32.totalorder %v2135_v2, %v1568_v44  ;;  %v2207_v36 = vand.u32 1, %v624_v0  ;;  %v635_v23 = vand.u32 1, %v626_v53 }
  0xbd   :  { %vm607_vm15 = vcmp.eq.s32.totalorder %v598_v28, 0  ;;  %v376_v37 = vsel %vm357_vm13, %v367_v54, %v320_v7  ;;  %v263_v63 = vsel %vm244_vm14, %v254_v13, %v207_v29  ;;  %vm469_vm3 = vcmp.eq.s32.totalorder %v2114_v48, %v1797_v59 }
  0xbe   :  { %v616_v33 = vsel %vm607_vm15, 1, %v598_v28  ;;  %v423_v8 = vor.u32 %v1679_v15, %v376_v37  ;;  %v310_v11 = vor.u32 %v1555_v40, %v263_v63  ;;  %vm356_vm4 = vcmp.eq.s32.totalorder %v2135_v2, %v1634_v61 }
  0xbf   :  { %728 = vadd.xlane.f32.xlu1 %v727_v35  ;;  %749 = vadd.xlane.f32.xlu2 %v748_v18  ;;  %v627_v32 = vshra.s32 %v616_v33, %v1889_v41  ;;  %v736_v44 = vsel %vm657_vm0, %v2174_v1, 0.0  ;;  %v754_v40 = vsel %vm657_vm0, %v741_v57, 0.0  ;;  %v642_v50 = vcvt.s32.f32 %v2207_v36 }
  0xc0   :  { %v432_v4 = vsel %vm413_vm1, %v423_v8, %v376_v37  ;;  %v319_v19 = vsel %vm300_vm2, %v310_v11, %v263_v63  ;;  %vm525_vm5 = vcmp.eq.s32.totalorder %v2114_v48, %v1897_v45  ;;  %v644_v42 = vcvt.s32.f32 %v635_v23 }
  0xc1   :  { %v2214_v34 = vand.u32 1, %v627_v32  ;;  %v479_v31 = vor.u32 %v1788_v56, %v432_v4  ;;  %v366_v5 = vor.u32 %v1619_v55, %v319_v19  ;;  %vm412_vm6 = vcmp.eq.s32.totalorder %v2135_v2, %v1673_v14 }
  0xc2   :  { %vm581_vm7 = vcmp.eq.s32.totalorder %v2114_v48, %v1993_v26  ;;  %vm468_vm8 = vcmp.eq.s32.totalorder %v2135_v2, %v1797_v59  ;;  %v742_v14 = vmul.f32 %v1924_v52, %v642_v50  ;;  %v744_v22 = vmul.f32 %v2137_v3, %v644_v42 }
  0xc3   :  { %v645_v62 = vcvt.s32.f32 %v2214_v34  ;;  %v488_v46 = vsel %vm469_vm3, %v479_v31, %v432_v4  ;;  %v375_v9 = vsel %vm356_vm4, %v366_v5, %v319_v19  ;;  %vm524_vm9 = vcmp.eq.s32.totalorder %v2135_v2, %v1897_v45 }
  0xc4   :  { %v535_v61 = vor.u32 %v1878_v39, %v488_v46  ;;  %v422_v30 = vor.u32 %v1679_v15, %v375_v9  ;;  %v757_v24 = vsel %vm657_vm0, %v742_v14, 0.0  ;;  %v763_v59 = vsel %vm657_vm0, %v744_v22, 0.0 }
  0xc5   :  { %v745_v55 = vmul.f32 %v2017_v20, %v645_v62  ;;  %vm580_vm11 = vcmp.eq.s32.totalorder %v2135_v2, %v1993_v26  ;;  %v846_v28 = vmul.f32 %v2052_v27, %v642_v50  ;;  %v849_v57 = vmul.f32 %v2052_v27, %v645_v62 }
  0xc6   :  { %v544_v21 = vsel %vm525_vm5, %v535_v61, %v488_v46  ;;  %v431_v38 = vsel %vm412_vm6, %v422_v30, %v375_v9 }
  0xc7   :  { %737 = vadd.xlane.f32.xlu1 %v736_v44  ;;  %755 = vadd.xlane.f32.xlu2 %v754_v40  ;;  %v766_v43 = vsel %vm657_vm0, %v745_v55, 0.0  ;;  %v591_v20 = vor.u32 %v1986_v17, %v544_v21  ;;  %v478_v25 = vor.u32 %v1788_v56, %v431_v38  ;;  %v845_v56 = vmul.f32 %v2052_v27, %v641_v47 }
  0xc8   :  { %767 = vadd.xlane.f32.xlu0 %v766_v43  ;;  %v848_v47 = vmul.f32 %v2052_v27, %v644_v42  ;;  %v861_v54 = vsel %vm657_vm0, %v846_v28, 0.0  ;;  %v870_v33 = vsel %vm657_vm0, %v849_v57, 0.0 }
  0xc9   :  { %v600_v15 = vsel %vm581_vm7, %v591_v20, %v544_v21  ;;  %v487_v16 = vsel %vm468_vm8, %v478_v25, %v431_v38  ;;  %v858_v18 = vsel %vm657_vm0, %v845_v56, 0.0 }
  0xca   :  { %vm609_vm10 = vcmp.eq.s32.totalorder %v600_v15, 0  ;;  %v534_v48 = vor.u32 %v1878_v39, %v487_v16 }
  0xcb   :  { %v618_v52 = vsel %vm609_vm10, 1, %v600_v15 }
  0xcc   :  { %v629_v3 = vshra.s32 %v618_v52, %v1889_v41  ;;  %v543_v12 = vsel %vm524_vm9, %v534_v48, %v487_v16 }
  0xcd   :  { %v590_v45 = vor.u32 %v1986_v17, %v543_v12  ;;  %v847_v17 = vmul.f32 %v2052_v27, %v643_v6 }
  0xce   :  { %v638_v39 = vand.u32 1, %v629_v3 }
  0xcf   :  { %758 = vadd.xlane.f32.xlu1 %v757_v24  ;;  %764 = vadd.xlane.f32.xlu2 %v763_v59  ;;  %v599_v60 = vsel %vm580_vm11, %v590_v45, %v543_v12  ;;  %v864_v53 = vsel %vm657_vm0, %v847_v17, 0.0 }
  0xd0   :  { %v647_v35 = vcvt.s32.f32 %v638_v39  ;;  %vm608_vm12 = vcmp.eq.s32.totalorder %v599_v60, 0 }
  0xd1   :  { %v617_v0 = vsel %vm608_vm12, 1, %v599_v60 }
  0xd2   :  { %v747_v51 = vmul.f32 %v2174_v1, %v647_v35  ;;  %v628_v7 = vshra.s32 %v617_v0, %v1889_v41  ;;  %v867_v41 = vsel %vm657_vm0, %v848_v47, 0.0  ;;  %v851_v6 = vmul.f32 %v2052_v27, %v647_v35 }
  0xd4   :  { %v772_v26 = vsel %vm657_vm0, %v747_v51, 0.0  ;;  %v637_v2 = vand.u32 1, %v628_v7 }
  0xd6   :  { %v646_v10 = vcvt.s32.f32 %v637_v2 }
  0xd7   :  { %859 = vadd.xlane.f32.xlu1 %v858_v18  ;;  %773 = vadd.xlane.f32.xlu2 %v772_v26 }
  0xd8   :  { %v746_v29 = vmul.f32 %v2116_v49, %v646_v10  ;;  %v850_v58 = vmul.f32 %v2052_v27, %v646_v10  ;;  %v876_v49 = vsel %vm657_vm0, %v851_v6, 0.0 }
  0xda   :  { %v769_v1 = vsel %vm657_vm0, %v746_v29, 0.0  ;;  %v873_v13 = vsel %vm657_vm0, %v850_v58, 0.0  ;;  %vm933_vm0 = vcmask 7168  }
  0xdb   :  { %770 = vadd.xlane.f32.xlu0 %v769_v1 }
  0xdf   :  { %865 = vadd.xlane.f32.xlu1 %v864_v53  ;;  %868 = vadd.xlane.f32.xlu2 %v867_v41 }
  0xe3   :  { %862 = vadd.xlane.f32.xlu0 %v861_v54 }
  0xe7   :  { %874 = vadd.xlane.f32.xlu1 %v873_v13  ;;  %877 = vadd.xlane.f32.xlu2 %v876_v49 }
  0xeb   :  { %871 = vadd.xlane.f32.xlu0 %v870_v33 }
 0x100   :  { %v714_v37 = vpop.xlane.xlu0 %713 }
 0x108   :  { %v723_v32 = vpop.xlane.xlu0 %722 }
 0x110   :  { %v732_v23 = vpop.xlane.xlu0 %731 }
 0x11a   :  { %v2277_v63 = vpop.xlane.xlu2 %856  ;;  %v2279_v36 = vpop.xlane.xlu1 %853 }
 0x11b   :  { %v753_v27 = vpop.xlane.xlu0 %752  ;;  %v907_v41 = vsub.f32 0.0, %v2277_v63  ;;  %v906_v6 = vsub.f32 0.0, %v2279_v36 }
 0x122   :  { %v720_v8 = vpop.xlane.xlu2 %719  ;;  %v717_v11 = vpop.xlane.xlu1 %716 }
 0x123   :  { %1075 = vrcp.f32 %v717_v11  ;;  %v762_v61 = vpop.xlane.xlu0 %761 }
 0x124   :  { %1077 = vrcp.f32 %v714_v37 }
 0x125   :  { %1079 = vrcp.f32 %v720_v8 }
 0x129   :  { %v1076_v31 = vpop.eup %1075 }
 0x12a   :  { %v726_v4 = vpop.xlane.xlu1 %725  ;;  %v735_v19 = vpop.xlane.xlu2 %734  ;;  %v785_v40 = vmul.f32 %v1076_v31, %v753_v27 }
 0x12b   :  { %v1078_v5 = vpop.eup %1077  ;;  %1081 = vrcp.f32 %v726_v4 }
 0x12c   :  { %v794_v46 = vmax.f32 %v785_v40, 1e-30  ;;  %v1080_v9 = vpop.eup %1079  ;;  %1083 = vrcp.f32 %v723_v32 }
 0x12e   :  { %v803_v43 = vmin.f32 %v794_v46, 1.0 }
 0x130   :  { %v880_v25 = vsub.f32 1.0, %v803_v43 }
 0x131   :  { %v1082_v20 = vpop.eup %1081 }
 0x132   :  { %v729_v34 = vpop.xlane.xlu1 %728  ;;  %v750_v44 = vpop.xlane.xlu2 %749  ;;  %v788_v15 = vmul.f32 %v1082_v20, %v762_v61  ;;  %v889_v56 = vmax.f32 %v880_v25, 0.0 }
 0x133   :  { %v784_v50 = vmul.f32 %v1078_v5, %v750_v44  ;;  %1085 = vrcp.f32 %v729_v34  ;;  %v1084_v16 = vpop.eup %1083 }
 0x134   :  { %1087 = vrcp.f32 %v732_v23  ;;  %v797_v45 = vmax.f32 %v788_v15, 1e-30  ;;  %v898_v2 = vmul.f32 %v889_v56, %v889_v56 }
 0x135   :  { %v793_v55 = vmax.f32 %v784_v50, 1e-30 }
 0x136   :  { %v806_v17 = vmin.f32 %v797_v45, 1.0  ;;  %v916_v49 = vmul.f32 %v907_v41, %v898_v2 }
 0x137   :  { %v802_v21 = vmin.f32 %v793_v55, 1.0 }
 0x138   :  { %v883_v57 = vsub.f32 1.0, %v806_v17 }
 0x139   :  { %v879_v48 = vsub.f32 1.0, %v802_v21  ;;  %v1086_v24 = vpop.eup %1085 }
 0x13a   :  { %v738_v62 = vpop.xlane.xlu1 %737  ;;  %v756_v42 = vpop.xlane.xlu2 %755  ;;  %v892_v40 = vmax.f32 %v883_v57, 0.0 }
 0x13b   :  { %v786_v30 = vmul.f32 %v1080_v9, %v756_v42  ;;  %1089 = vrcp.f32 %v738_v62  ;;  %v768_v12 = vpop.xlane.xlu0 %767  ;;  %v888_v39 = vmax.f32 %v879_v48, 0.0  ;;  %v1088_v0 = vpop.eup %1087 }
 0x13c   :  { %1091 = vlog2.f32 %v803_v43  ;;  %v790_v29 = vmul.f32 %v1088_v0, %v768_v12  ;;  %v901_v25 = vmul.f32 %v892_v40, %v892_v40 }
 0x13d   :  { %v795_v38 = vmax.f32 %v786_v30, 1e-30  ;;  %1093 = vlog2.f32 %v802_v21  ;;  %v897_v47 = vmul.f32 %v888_v39, %v888_v39 }
 0x13e   :  { %1095 = vrcp.f32 %v735_v19  ;;  %v799_v11 = vmax.f32 %v790_v29, 1e-30 }
 0x13f   :  { %v804_v59 = vmin.f32 %v795_v38, 1.0  ;;  %v915_v8 = vmul.f32 %v906_v6, %v897_v47 }
 0x140   :  { %v808_v46 = vmin.f32 %v799_v11, 1.0 }
 0x141   :  { %v881_v60 = vsub.f32 1.0, %v804_v59  ;;  %v1090_v26 = vpop.eup %1089  ;;  %1097 = vlog2.f32 %v804_v59 }
 0x142   :  { %v759_v14 = vpop.xlane.xlu1 %758  ;;  %v765_v22 = vpop.xlane.xlu2 %764  ;;  %1099 = vlog2.f32 %v806_v17  ;;  %v885_v48 = vsub.f32 1.0, %v808_v46 }
 0x143   :  { %v787_v52 = vmul.f32 %v1084_v16, %v759_v14  ;;  %v789_v3 = vmul.f32 %v1086_v24, %v765_v22  ;;  %v1092_v10 = vpop.eup %1091  ;;  %v890_v28 = vmax.f32 %v881_v60, 0.0 }
 0x144   :  { %v1094_v1 = vpop.eup %1093  ;;  %v814_v13 = vmul.f32 0.6931472, %v1092_v10 }
 0x145   :  { %v796_v35 = vmax.f32 %v787_v52, 1e-30  ;;  %v798_v51 = vmax.f32 %v789_v3, 1e-30  ;;  %v1096_v37 = vpop.eup %1095  ;;  %v812_v32 = vmul.f32 0.6931472, %v1094_v1  ;;  %v899_v34 = vmul.f32 %v890_v28, %v890_v28 }
 0x146   :  { %v925_v5 = vmul.f32 %v916_v49, %v814_v13 }
 0x147   :  { %v805_v58 = vmin.f32 %v796_v35, 1.0  ;;  %v807_v54 = vmin.f32 %v798_v51, 1.0  ;;  %v1098_v27 = vpop.eup %1097  ;;  %v924_v42 = vmul.f32 %v915_v8, %v812_v32 }
 0x148   :  { %v816_v55 = vmul.f32 0.6931472, %v1098_v27  ;;  %v1100_v38 = vpop.eup %1099  ;;  %v935_v14 = vsel %vm933_vm0, %v925_v5, 0.0 }
 0x149   :  { %v882_v19 = vsub.f32 1.0, %v805_v58  ;;  %1101 = vlog2.f32 %v805_v58  ;;  %v884_v31 = vsub.f32 1.0, %v807_v54  ;;  %v934_v16 = vsel %vm933_vm0, %v924_v42, 0.0 }
 0x14a   :  { %v860_v18 = vpop.xlane.xlu1 %859  ;;  %v774_v7 = vpop.xlane.xlu2 %773  ;;  %1103 = vlog2.f32 %v807_v54  ;;  %v820_v45 = vmul.f32 0.6931472, %v1100_v38  ;;  %v936_v2 = vadd.f32 %v935_v14, %v934_v16 }
 0x14b   :  { %v792_v53 = vmul.f32 %v1090_v26, %v774_v7  ;;  %v908_v33 = vsub.f32 0.0, %v860_v18  ;;  %v891_v61 = vmax.f32 %v882_v19, 0.0  ;;  %v893_v21 = vmax.f32 %v884_v31, 0.0 }
 0x14c   :  { %1105 = vlog2.f32 %v808_v46  ;;  %v894_v26 = vmax.f32 %v885_v48, 0.0 }
 0x14d   :  { %v801_v23 = vmax.f32 %v792_v53, 1e-30  ;;  %v917_v50 = vmul.f32 %v908_v33, %v899_v34  ;;  %v900_v12 = vmul.f32 %v891_v61, %v891_v61  ;;  %v902_v39 = vmul.f32 %v893_v21, %v893_v21 }
 0x14e   :  { %v771_v4 = vpop.xlane.xlu0 %770 }
 0x14f   :  { %v791_v44 = vmul.f32 %v1096_v37, %v771_v4  ;;  %v810_v9 = vmin.f32 %v801_v23, 1.0  ;;  %v926_v22 = vmul.f32 %v917_v50, %v816_v55  ;;  %v1102_v15 = vpop.eup %1101  ;;  %v903_v37 = vmul.f32 %v894_v26, %v894_v26 }
 0x150   :  { %v818_v35 = vmul.f32 0.6931472, %v1102_v15  ;;  %v1104_v7 = vpop.eup %1103 }
 0x151   :  { %v800_v62 = vmax.f32 %v791_v44, 1e-30  ;;  %v887_v24 = vsub.f32 1.0, %v810_v9  ;;  %v937_v18 = vsel %vm933_vm0, %v926_v22, 0.0  ;;  %v822_v58 = vmul.f32 0.6931472, %v1104_v7 }
 0x152   :  { %v866_v63 = vpop.xlane.xlu1 %865  ;;  %v869_v36 = vpop.xlane.xlu2 %868  ;;  %v938_v28 = vadd.f32 %v937_v18, %v936_v2 }
 0x153   :  { %v809_v30 = vmin.f32 %v800_v62, 1.0  ;;  %v910_v43 = vsub.f32 0.0, %v866_v63  ;;  %v911_v3 = vsub.f32 0.0, %v869_v36  ;;  %v896_v17 = vmax.f32 %v887_v24, 0.0  ;;  %v1106_v41 = vpop.eup %1105 }
 0x154   :  { %v824_v44 = vmul.f32 0.6931472, %v1106_v41 }
 0x155   :  { %v886_v20 = vsub.f32 1.0, %v809_v30  ;;  %v919_v52 = vmul.f32 %v910_v43, %v901_v25  ;;  %1107 = vlog2.f32 %v809_v30  ;;  %v920_v29 = vmul.f32 %v911_v3, %v902_v39 }
 0x156   :  { %v863_v59 = vpop.xlane.xlu0 %862  ;;  %1109 = vlog2.f32 %v810_v9  ;;  %v905_v33 = vmul.f32 %v896_v17, %v896_v17 }
 0x157   :  { %v909_v56 = vsub.f32 0.0, %v863_v59  ;;  %v895_v0 = vmax.f32 %v886_v20, 0.0  ;;  %v928_v47 = vmul.f32 %v919_v52, %v820_v45  ;;  %v929_v11 = vmul.f32 %v920_v29, %v822_v58 }
 0x159   :  { %v918_v51 = vmul.f32 %v909_v56, %v900_v12  ;;  %v904_v54 = vmul.f32 %v895_v0, %v895_v0  ;;  %v941_v8 = vsel %vm933_vm0, %v928_v47, 0.0  ;;  %v943_v5 = vsel %vm933_vm0, %v929_v11, 0.0 }
 0x15a   :  { %v875_v60 = vpop.xlane.xlu1 %874  ;;  %v878_v10 = vpop.xlane.xlu2 %877 }
 0x15b   :  { %v927_v53 = vmul.f32 %v918_v51, %v818_v35  ;;  %v913_v1 = vsub.f32 0.0, %v875_v60  ;;  %v914_v13 = vsub.f32 0.0, %v878_v10  ;;  %v1108_v49 = vpop.eup %1107 }
 0x15c   :  { %v1110_v19 = vpop.eup %1109  ;;  %v826_v63 = vmul.f32 0.6931472, %v1108_v49 }
 0x15d   :  { %v939_v6 = vsel %vm933_vm0, %v927_v53, 0.0  ;;  %v922_v23 = vmul.f32 %v913_v1, %v904_v54  ;;  %v923_v27 = vmul.f32 %v914_v13, %v905_v33  ;;  %v828_v36 = vmul.f32 0.6931472, %v1110_v19 }
 0x15e   :  { %v940_v57 = vadd.f32 %v939_v6, %v938_v28  ;;  %v872_v32 = vpop.xlane.xlu0 %871 }
 0x15f   :  { %v912_v4 = vsub.f32 0.0, %v872_v32  ;;  %v931_v40 = vmul.f32 %v922_v23, %v826_v63  ;;  %v932_v42 = vmul.f32 %v923_v27, %v828_v36 }
 0x160   :  { %v942_v34 = vadd.f32 %v941_v8, %v940_v57 }
 0x161   :  { %v921_v31 = vmul.f32 %v912_v4, %v903_v37  ;;  %v947_v55 = vsel %vm933_vm0, %v931_v40, 0.0  ;;  %v949_v30 = vsel %vm933_vm0, %v932_v42, 0.0 }
 0x162   :  { %v944_v62 = vadd.f32 %v943_v5, %v942_v34 }
 0x163   :  { %v930_v50 = vmul.f32 %v921_v31, %v824_v44 }
 0x165   :  { %v945_v46 = vsel %vm933_vm0, %v930_v50, 0.0 }
 0x166   :  { %v946_v9 = vadd.f32 %v945_v46, %v944_v62 }
 0x168   :  { %v948_v61 = vadd.f32 %v947_v55, %v946_v9 }
 0x16a   :  { %v950_v43 = vadd.f32 %v949_v30, %v948_v61 }
 0x16c   :  { %951 = vadd.xlane.f32.xlu0 %v950_v43 }
 0x1df   :  { %v952_v21 = vpop.xlane.xlu0 %951 }
 0x1e0   :  { %v953_v38 = vrot.slane %v952_v21, 4 }
 0x1e2   :  { %v954_v14 = vadd.f32 %v953_v38, %v952_v21 }
 0x1e4   :  { %v955_v22 = vrot.slane %v954_v14, 2 }
 0x1e6   :  { %v956_v20 = vadd.f32 %v955_v22, %v954_v14 }
 0x1e8   :  { %v957_v25 = vrot.slane %v956_v20, 1 }
 0x1ea   :  { %v958_v15 = vadd.f32 %v957_v25, %v956_v20 }
 0x1ec   :  { %1052 = vpush %v958_v15 }
 0x21d   :  { %s1053_s23 = spop %1052 }
 0x21e   :  { %s960_s19 = smul.f32 0.013888889, %s1053_s23 }
 0x220   :  { %962 = sst [smem:[#allocation7]] %s960_s19 }
 0x221   :  { %971 = dma.smem_to_hbm %s1157_s26, 16, %s969_s18, [#allocation3]  }
 0x222   :  { %1153 = dma.done.wait [#allocation3], 16  }
 0x223   :  { %1154 = vsyncadd [#allocation3], 4294967280 }
 0x224   :  { %976 = sfence }
 0x225   :  { %977 = vsyncpa [#allocation3], 1 }
 0x226   :  { %978 = vsyncpa [#allocation4], 1 }
 0x227   :  { %979 = vsyncpa [#allocation6], 1 }

</bundles_post_ra>
